<compile_context>
chip_gen: v7x
topology: tpu7x:2x2x1
jax: 0.10.0
libtpu: 0.0.40
codegen_flags: <defaults>
</compile_context>

<pallas_src>
import functools
import math

import jax
import jax.numpy as jnp
from jax.experimental import pallas as pl
from jax.experimental.pallas import tpu as pltpu


# ----------------------------------------------------------------------------
# Fused Pallas kernel
# ----------------------------------------------------------------------------
def _make_bilstm_kernel(T, B_pad, H, num_layers):
    """Ref order: x, (wih, whh, b) * L, fc_w_row, fc_b, out, hseq_scratch."""
    G2, G4, G6, G8 = 2 * H, 4 * H, 6 * H, 8 * H

    def kernel(*refs):
        x_ref = refs[0]
        layer_refs = refs[1:1 + 3 * num_layers]
        fcw_ref, fcb_ref, o_ref, hseq_ref = refs[1 + 3 * num_layers:]

        # Lane mask: True on columns belonging to the forward direction
        # (each 2H gate slab is [fwd H | bwd H]).  Hoisted out of all loops.
        lane = jax.lax.broadcasted_iota(jnp.int32, (B_pad, G8), 1)
        fwd_mask = (lane % G2) < H

        for l in range(num_layers):
            wih_ref, whh_ref, b_ref = layer_refs[3 * l:3 * l + 3]
            x_in = x_ref[...] if l == 0 else hseq_ref[...].astype(jnp.bfloat16)

            # Hoisted input projection for all timesteps / both directions:
            # one (T*B_pad, D_in) @ (D_in, 8H) matmul, off the serial path.
            proj = jnp.dot(x_in, wih_ref[...],
                           preferred_element_type=jnp.float32) + b_ref[...]
            whh = whh_ref[...]                                   # (2H, 8H) bf16

            h_cat = jnp.zeros((B_pad, G2), jnp.float32)          # [h_fwd | h_bwd]
            c_cat = jnp.zeros((B_pad, G2), jnp.float32)
            h_bf = jnp.zeros((B_pad, G2), jnp.bfloat16)

            for s in range(T):                                   # static unroll (T small)
                r0 = s * B_pad
                rb0 = (T - 1 - s) * B_pad
                # fwd consumes time s, bwd consumes time T-1-s; both slices are
                # sublane-aligned and the select is off the recurrent chain.
                x_g = jnp.where(fwd_mask,
                                proj[r0:r0 + B_pad, :],
                                proj[rb0:rb0 + B_pad, :])
                gates = x_g + jnp.dot(h_bf, whh,
                                      preferred_element_type=jnp.float32)
                sg = jax.nn.sigmoid(gates[:, 0:G6])              # i, f, o (both dirs)
                gg = jnp.tanh(gates[:, G6:G8])                   # g       (both dirs)
                i_g = sg[:, 0:G2]
                f_g = sg[:, G2:G4]
                o_g = sg[:, G4:G6]
                c_cat = f_g * c_cat + i_g * gg
                h_cat = o_g * jnp.tanh(c_cat)
                h_bf = h_cat.astype(jnp.bfloat16)                # explicit cast, next-step matmul lhs
                # Store hidden states at their final time offsets: the fwd half
                # belongs to time s, the bwd half to time T-1-s.
                hseq_ref[r0:r0 + B_pad, 0:H] = h_cat[:, 0:H]
                hseq_ref[rb0:rb0 + B_pad, H:G2] = h_cat[:, H:G2]

        # FC + sigmoid head: VPU broadcast-multiply + lane reduction over 2H,
        # written as a lane-dense 128-wide slab (wrapper keeps column 0).
        h_final = hseq_ref[...]                                  # (T*B_pad, 2H) f32
        y = jnp.sum(h_final * fcw_ref[...], axis=1, keepdims=True) + fcb_ref[...]
        o_ref[...] = jnp.broadcast_to(jax.nn.sigmoid(y), (T * B_pad, 128))

    return kernel


# ----------------------------------------------------------------------------
# Parameters (PyTorch-style init) + kernel-friendly packing
# ----------------------------------------------------------------------------
def init_bilstm_params(key, input_size, hidden_size, num_layers, bidirectional):
    """U(-1/sqrt(H), 1/sqrt(H)) init like torch; keeps raw (torch-layout) and
    packed (kernel-layout, bf16) copies of the LSTM weights.

    Packed column order (8H): [i_f, i_b, f_f, f_b, o_f, o_b, g_f, g_b]
      - sigmoid region = lanes [0, 6H), tanh region = lanes [6H, 8H)
      - each logical gate is a contiguous [fwd | bwd] 2H slab.
    """
    assert bidirectional, "fused kernel implements the bidirectional module"
    H = hidden_size
    k = 1.0 / math.sqrt(H)
    gate_order = (0, 1, 3, 2)          # torch row-blocks are [i, f, g, o] -> take i, f, o, g
    raw_layers, packed_layers = [], []
    for layer in range(num_layers):
        d_in = input_size if layer == 0 else 2 * H
        dirs = []
        for _ in range(2):             # forward, backward
            key, k1, k2, k3, k4 = jax.random.split(key, 5)
            dirs.append({
                "w_ih": jax.random.uniform(k1, (4 * H, d_in), jnp.float32, -k, k),
                "w_hh": jax.random.uniform(k2, (4 * H, H), jnp.float32, -k, k),
                "b_ih": jax.random.uniform(k3, (4 * H,), jnp.float32, -k, k),
                "b_hh": jax.random.uniform(k4, (4 * H,), jnp.float32, -k, k),
            })
        raw_layers.append(dirs)
        fw, bw = dirs

        wih_cols, whh_cols, b_cols = [], [], []
        zH = jnp.zeros((H, H), jnp.float32)
        for g in gate_order:
            sl = slice(g * H, (g + 1) * H)
            # input weights: (d_in, H) per gate/direction
            wih_cols += [fw["w_ih"][sl, :].T, bw["w_ih"][sl, :].T]
            # recurrent weights: rows [h_fwd (H) | h_bwd (H)], zero off-direction block
            whh_cols += [jnp.concatenate([fw["w_hh"][sl, :].T, zH], axis=0),
                         jnp.concatenate([zH, bw["w_hh"][sl, :].T], axis=0)]
            # fused biases
            b_cols += [fw["b_ih"][sl] + fw["b_hh"][sl],
                       bw["b_ih"][sl] + bw["b_hh"][sl]]

        packed_layers.append({
            "wih": jnp.concatenate(wih_cols, axis=1).astype(jnp.bfloat16),  # (d_in, 8H)
            "whh": jnp.concatenate(whh_cols, axis=1).astype(jnp.bfloat16),  # (2H, 8H)
            "b": jnp.concatenate(b_cols)[None, :],                           # (1, 8H) f32
        })

    fc_in = 2 * H
    kf = 1.0 / math.sqrt(fc_in)
    key, k5, k6 = jax.random.split(key, 3)
    return {
        "hidden_size": H,
        "raw_layers": raw_layers,
        "packed_layers": packed_layers,
        "fc_w": jax.random.uniform(k5, (fc_in, 1), jnp.float32, -kf, kf),
        "fc_b": jax.random.uniform(k6, (1, 1), jnp.float32, -kf, kf),
    }


# ----------------------------------------------------------------------------
# Forward wrapper (one grid-less pallas_call)
# ----------------------------------------------------------------------------
def bilstm_forward(params, x_btd):
    """x_btd: (B, T, input_size) batch-first, like the torch module. Returns (B, T, 1)."""
    B, T, _ = x_btd.shape
    H = params["hidden_size"]
    num_layers = len(params["packed_layers"])
    B_pad = ((B + 7) // 8) * 8                     # sublane-aligned batch

    # Time-major, batch padded to B_pad: row t*B_pad + b == x[b, t, :]; bf16 matmul input.
    x_tb = jnp.transpose(x_btd, (1, 0, 2))          # (T, B, D)
    if B_pad != B:
        x_tb = jnp.pad(x_tb, ((0, 0), (0, B_pad - B), (0, 0)))
    x_flat = x_tb.reshape(T * B_pad, -1).astype(jnp.bfloat16)

    operands = [x_flat]
    for lyr in params["packed_layers"]:
        operands += [lyr["wih"], lyr["whh"], lyr["b"]]
    operands += [params["fc_w"].reshape(1, 2 * H), params["fc_b"]]

    out = pl.pallas_call(
        _make_bilstm_kernel(T, B_pad, H, num_layers),
        out_shape=jax.ShapeDtypeStruct((T * B_pad, 128), jnp.float32),
        in_specs=[pl.BlockSpec(op.shape, lambda: (0, 0)) for op in operands],
        out_specs=pl.BlockSpec((T * B_pad, 128), lambda: (0, 0)),
        scratch_shapes=[pltpu.VMEM((T * B_pad, 2 * H), jnp.float32)],
    )(*operands)

    # Column 0 of the lane-dense slab holds the result; drop batch padding.
    y = out[:, 0].reshape(T, B_pad)[:, :B]          # (T, B)
    return y.transpose(1, 0)[:, :, None]            # (B, T, 1)


# ----------------------------------------------------------------------------
# Plain-JAX reference (torch-layout weights, mirrors the kernel's bf16 matmuls)
# ----------------------------------------------------------------------------
def bilstm_reference(params, x_btd):
    B, T, _ = x_btd.shape
    H = params["hidden_size"]
    seq = x_btd.astype(jnp.float32)                          # (B, T, D)
    for dirs in params["raw_layers"]:
        outs = []
        for d, p in enumerate(dirs):
            w_ih = p["w_ih"].astype(jnp.bfloat16)
            w_hh = p["w_hh"].astype(jnp.bfloat16)
            bias = p["b_ih"] + p["b_hh"]
            h = jnp.zeros((B, H), jnp.float32)
            c = jnp.zeros((B, H), jnp.float32)
            out_t = [None] * T
            order = range(T) if d == 0 else range(T - 1, -1, -1)
            for t in order:
                x_t = seq[:, t, :].astype(jnp.bfloat16)
                g = (jnp.dot(x_t, w_ih.T, preferred_element_type=jnp.float32)
                     + jnp.dot(h.astype(jnp.bfloat16), w_hh.T,
                               preferred_element_type=jnp.float32) + bias)
                i = jax.nn.sigmoid(g[:, 0:H])
                f = jax.nn.sigmoid(g[:, H:2 * H])
                gg = jnp.tanh(g[:, 2 * H:3 * H])
                o = jax.nn.sigmoid(g[:, 3 * H:4 * H])
                c = f * c + i * gg
                h = o * jnp.tanh(c)
                out_t[t] = h
            outs.append(jnp.stack(out_t, axis=1))            # (B, T, H)
        seq = jnp.concatenate(outs, axis=-1)                 # (B, T, 2H)
    y = jnp.einsum("bth,ho->bto", seq, params["fc_w"]) + params["fc_b"][0, 0]
    return jax.nn.sigmoid(y)


# ----------------------------------------------------------------------------
# main
# ----------------------------------------------------------------------------
if __name__ == "__main__":
    # BiLSTM(input_size=16, hidden_size=32, num_layers=2, bidirectional=True, dropout=0.0)
    B, T = 2, 8
    input_size, hidden_size, num_layers, bidirectional = 16, 32, 2, True

    key = jax.random.PRNGKey(0)
    key, kx, kp = jax.random.split(key, 3)
    x = jax.random.normal(kx, (B, T, input_size), dtype=jnp.float32)
    params = init_bilstm_params(kp, input_size, hidden_size, num_layers, bidirectional)

    fwd = jax.jit(functools.partial(bilstm_forward, params))
    out = fwd(x)
    jax.block_until_ready(out)

    assert out.shape == (B, T, 1), out.shape
    assert bool(jnp.all((out >= 0.0) & (out <= 1.0)))

    ref = bilstm_reference(params, x)
    max_err = float(jnp.max(jnp.abs(out - ref)))
    assert max_err < 5e-3, max_err

    print("KERNEL_OK")
</pallas_src>

<mosaic_0001>
module attributes {stable_mosaic.version = 11 : i64} {
  func.func @kernel(%arg0: memref<64x16xbf16, #tpu.memory_space<vmem>>, %arg1: memref<16x256xbf16, #tpu.memory_space<vmem>>, %arg2: memref<64x256xbf16, #tpu.memory_space<vmem>>, %arg3: memref<1x256xf32, #tpu.memory_space<vmem>>, %arg4: memref<64x256xbf16, #tpu.memory_space<vmem>>, %arg5: memref<64x256xbf16, #tpu.memory_space<vmem>>, %arg6: memref<1x256xf32, #tpu.memory_space<vmem>>, %arg7: memref<1x64xf32, #tpu.memory_space<vmem>>, %arg8: memref<1x1xf32, #tpu.memory_space<vmem>>, %arg9: memref<64x128xf32, #tpu.memory_space<vmem>>, %arg10: memref<64x64xf32, #tpu.memory_space<vmem>>) attributes {dimension_semantics = [], scalar_prefetch = 0 : i64, scratch_operands = 1 : i64, tpu.core_type = #tpu.core_type<tc>} {
    %0 = tpu.iota {dimensions = array<i32: 1>} : vector<8x256xi32>
    %c64_i32 = arith.constant 64 : i32
    %c0_i32 = arith.constant 0 : i32
    %1 = arith.cmpi eq, %c64_i32, %c0_i32 : i32
    %c1_i32 = arith.constant 1 : i32
    %2 = arith.select %1, %c1_i32, %c64_i32 : i32
    %3 = vector.broadcast %2 : i32 to vector<8x256xi32>
    %4 = arith.remsi %0, %3 : vector<8x256xi32>
    %c0_i32_0 = arith.constant 0 : i32
    %5 = vector.broadcast %c0_i32_0 : i32 to vector<8x256xi32>
    %6 = arith.cmpi ne, %4, %5 : vector<8x256xi32>
    %c0_i32_1 = arith.constant 0 : i32
    %7 = vector.broadcast %c0_i32_1 : i32 to vector<8x256xi32>
    %8 = arith.cmpi slt, %4, %7 : vector<8x256xi32>
    %c0_i32_2 = arith.constant 0 : i32
    %9 = arith.cmpi slt, %2, %c0_i32_2 : i32
    %10 = vector.broadcast %9 : i1 to vector<8x256xi1>
    %11 = vector.broadcast %10 : vector<8x256xi1> to vector<8x256xi1>
    %12 = arith.xori %8, %11 : vector<8x256xi1>
    %13 = arith.andi %12, %6 : vector<8x256xi1>
    %14 = vector.broadcast %2 : i32 to vector<8x256xi32>
    %15 = arith.addi %4, %14 : vector<8x256xi32>
    %16 = arith.select %13, %15, %4 : vector<8x256xi1>, vector<8x256xi32>
    %c32_i32 = arith.constant 32 : i32
    %17 = vector.broadcast %c32_i32 : i32 to vector<8x256xi32>
    %18 = arith.cmpi slt, %16, %17 : vector<8x256xi32>
    %c0 = arith.constant 0 : index
    %c0_3 = arith.constant 0 : index
    %19 = vector.load %arg0[%c0, %c0_3] : memref<64x16xbf16, #tpu.memory_space<vmem>>, vector<64x16xbf16>
    %c0_4 = arith.constant 0 : index
    %c0_5 = arith.constant 0 : index
    %20 = vector.load %arg1[%c0_4, %c0_5] : memref<16x256xbf16, #tpu.memory_space<vmem>>, vector<16x256xbf16>
    %cst = arith.constant dense<0.000000e+00> : vector<64x256xf32>
    %21 = tpu.matmul %19, %20, %cst {dimension_numbers = #tpu.dot_dimension_numbers<[1], [0], [0], [1], [0, 0, 1, 1], [], []>} : vector<64x16xbf16>, vector<16x256xbf16>, vector<64x256xf32> -> vector<64x256xf32>
    %c0_6 = arith.constant 0 : index
    %c0_7 = arith.constant 0 : index
    %22 = vector.load %arg3[%c0_6, %c0_7] : memref<1x256xf32, #tpu.memory_space<vmem>>, vector<1x256xf32>
    %23 = vector.broadcast %22 : vector<1x256xf32> to vector<64x256xf32>
    %24 = arith.addf %21, %23 : vector<64x256xf32>
    %c0_8 = arith.constant 0 : index
    %c0_9 = arith.constant 0 : index
    %25 = vector.load %arg2[%c0_8, %c0_9] : memref<64x256xbf16, #tpu.memory_space<vmem>>, vector<64x256xbf16>
    %cst_10 = arith.constant 0.000000e+00 : f32
    %26 = vector.broadcast %cst_10 : f32 to vector<8x64xf32>
    %cst_11 = arith.constant 0.000000e+00 : bf16
    %27 = vector.broadcast %cst_11 : bf16 to vector<8x64xbf16>
    %28 = vector.extract_strided_slice %24 {offsets = [0, 0], sizes = [8, 256], strides = [1, 1]} : vector<64x256xf32> to vector<8x256xf32>
    %29 = vector.extract_strided_slice %24 {offsets = [56, 0], sizes = [8, 256], strides = [1, 1]} : vector<64x256xf32> to vector<8x256xf32>
    %30 = arith.select %18, %28, %29 : vector<8x256xi1>, vector<8x256xf32>
    %cst_12 = arith.constant dense<0.000000e+00> : vector<8x256xf32>
    %31 = tpu.matmul %27, %25, %cst_12 {dimension_numbers = #tpu.dot_dimension_numbers<[1], [0], [0], [1], [0, 0, 1, 1], [], []>} : vector<8x64xbf16>, vector<64x256xbf16>, vector<8x256xf32> -> vector<8x256xf32>
    %32 = arith.addf %30, %31 : vector<8x256xf32>
    %33 = vector.extract_strided_slice %32 {offsets = [0, 0], sizes = [8, 192], strides = [1, 1]} : vector<8x256xf32> to vector<8x192xf32>
    %34 = arith.negf %33 : vector<8x192xf32>
    %35 = math.exp %34 : vector<8x192xf32>
    %cst_13 = arith.constant 1.000000e+00 : f32
    %36 = vector.broadcast %cst_13 : f32 to vector<8x192xf32>
    %37 = arith.addf %36, %35 : vector<8x192xf32>
    %38 = arith.divf %36, %37 : vector<8x192xf32>
    %39 = vector.extract_strided_slice %32 {offsets = [0, 192], sizes = [8, 64], strides = [1, 1]} : vector<8x256xf32> to vector<8x64xf32>
    %40 = math.tanh %39 : vector<8x64xf32>
    %41 = vector.extract_strided_slice %38 {offsets = [0, 0], sizes = [8, 64], strides = [1, 1]} : vector<8x192xf32> to vector<8x64xf32>
    %42 = vector.extract_strided_slice %38 {offsets = [0, 64], sizes = [8, 64], strides = [1, 1]} : vector<8x192xf32> to vector<8x64xf32>
    %43 = vector.extract_strided_slice %38 {offsets = [0, 128], sizes = [8, 64], strides = [1, 1]} : vector<8x192xf32> to vector<8x64xf32>
    %44 = arith.mulf %42, %26 : vector<8x64xf32>
    %45 = arith.mulf %41, %40 : vector<8x64xf32>
    %46 = arith.addf %44, %45 : vector<8x64xf32>
    %47 = math.tanh %46 : vector<8x64xf32>
    %48 = arith.mulf %43, %47 : vector<8x64xf32>
    %49 = arith.truncf %48 : vector<8x64xf32> to vector<8x64xbf16>
    %50 = vector.extract_strided_slice %48 {offsets = [0, 0], sizes = [8, 32], strides = [1, 1]} : vector<8x64xf32> to vector<8x32xf32>
    %c0_14 = arith.constant 0 : index
    %c0_15 = arith.constant 0 : index
    %51 = vector.load %arg10[%c0_14, %c0_15] : memref<64x64xf32, #tpu.memory_space<vmem>>, vector<8x32xf32>
    tpu.vector_store %arg10[%c0_14, %c0_15], %50 {strides = array<i32>} : memref<64x64xf32, #tpu.memory_space<vmem>>, vector<8x32xf32>,
    %52 = vector.extract_strided_slice %48 {offsets = [0, 32], sizes = [8, 32], strides = [1, 1]} : vector<8x64xf32> to vector<8x32xf32>
    %c56 = arith.constant 56 : index
    %c32 = arith.constant 32 : index
    %53 = vector.load %arg10[%c56, %c32] : memref<64x64xf32, #tpu.memory_space<vmem>>, vector<8x32xf32>
    tpu.vector_store %arg10[%c56, %c32], %52 {strides = array<i32>} : memref<64x64xf32, #tpu.memory_space<vmem>>, vector<8x32xf32>,
    %54 = vector.extract_strided_slice %24 {offsets = [8, 0], sizes = [8, 256], strides = [1, 1]} : vector<64x256xf32> to vector<8x256xf32>
    %55 = vector.extract_strided_slice %24 {offsets = [48, 0], sizes = [8, 256], strides = [1, 1]} : vector<64x256xf32> to vector<8x256xf32>
    %56 = arith.select %18, %54, %55 : vector<8x256xi1>, vector<8x256xf32>
    %cst_16 = arith.constant dense<0.000000e+00> : vector<8x256xf32>
    %57 = tpu.matmul %49, %25, %cst_16 {dimension_numbers = #tpu.dot_dimension_numbers<[1], [0], [0], [1], [0, 0, 1, 1], [], []>} : vector<8x64xbf16>, vector<64x256xbf16>, vector<8x256xf32> -> vector<8x256xf32>
    %58 = arith.addf %56, %57 : vector<8x256xf32>
    %59 = vector.extract_strided_slice %58 {offsets = [0, 0], sizes = [8, 192], strides = [1, 1]} : vector<8x256xf32> to vector<8x192xf32>
    %60 = arith.negf %59 : vector<8x192xf32>
    %61 = math.exp %60 : vector<8x192xf32>
    %cst_17 = arith.constant 1.000000e+00 : f32
    %62 = vector.broadcast %cst_17 : f32 to vector<8x192xf32>
    %63 = arith.addf %62, %61 : vector<8x192xf32>
    %64 = arith.divf %62, %63 : vector<8x192xf32>
    %65 = vector.extract_strided_slice %58 {offsets = [0, 192], sizes = [8, 64], strides = [1, 1]} : vector<8x256xf32> to vector<8x64xf32>
    %66 = math.tanh %65 : vector<8x64xf32>
    %67 = vector.extract_strided_slice %64 {offsets = [0, 0], sizes = [8, 64], strides = [1, 1]} : vector<8x192xf32> to vector<8x64xf32>
    %68 = vector.extract_strided_slice %64 {offsets = [0, 64], sizes = [8, 64], strides = [1, 1]} : vector<8x192xf32> to vector<8x64xf32>
    %69 = vector.extract_strided_slice %64 {offsets = [0, 128], sizes = [8, 64], strides = [1, 1]} : vector<8x192xf32> to vector<8x64xf32>
    %70 = arith.mulf %68, %46 : vector<8x64xf32>
    %71 = arith.mulf %67, %66 : vector<8x64xf32>
    %72 = arith.addf %70, %71 : vector<8x64xf32>
    %73 = math.tanh %72 : vector<8x64xf32>
    %74 = arith.mulf %69, %73 : vector<8x64xf32>
    %75 = arith.truncf %74 : vector<8x64xf32> to vector<8x64xbf16>
    %76 = vector.extract_strided_slice %74 {offsets = [0, 0], sizes = [8, 32], strides = [1, 1]} : vector<8x64xf32> to vector<8x32xf32>
    %c8 = arith.constant 8 : index
    %c0_18 = arith.constant 0 : index
    %77 = vector.load %arg10[%c8, %c0_18] : memref<64x64xf32, #tpu.memory_space<vmem>>, vector<8x32xf32>
    tpu.vector_store %arg10[%c8, %c0_18], %76 {strides = array<i32>} : memref<64x64xf32, #tpu.memory_space<vmem>>, vector<8x32xf32>,
    %78 = vector.extract_strided_slice %74 {offsets = [0, 32], sizes = [8, 32], strides = [1, 1]} : vector<8x64xf32> to vector<8x32xf32>
    %c48 = arith.constant 48 : index
    %c32_19 = arith.constant 32 : index
    %79 = vector.load %arg10[%c48, %c32_19] : memref<64x64xf32, #tpu.memory_space<vmem>>, vector<8x32xf32>
    tpu.vector_store %arg10[%c48, %c32_19], %78 {strides = array<i32>} : memref<64x64xf32, #tpu.memory_space<vmem>>, vector<8x32xf32>,
    %80 = vector.extract_strided_slice %24 {offsets = [16, 0], sizes = [8, 256], strides = [1, 1]} : vector<64x256xf32> to vector<8x256xf32>
    %81 = vector.extract_strided_slice %24 {offsets = [40, 0], sizes = [8, 256], strides = [1, 1]} : vector<64x256xf32> to vector<8x256xf32>
    %82 = arith.select %18, %80, %81 : vector<8x256xi1>, vector<8x256xf32>
    %cst_20 = arith.constant dense<0.000000e+00> : vector<8x256xf32>
    %83 = tpu.matmul %75, %25, %cst_20 {dimension_numbers = #tpu.dot_dimension_numbers<[1], [0], [0], [1], [0, 0, 1, 1], [], []>} : vector<8x64xbf16>, vector<64x256xbf16>, vector<8x256xf32> -> vector<8x256xf32>
    %84 = arith.addf %82, %83 : vector<8x256xf32>
    %85 = vector.extract_strided_slice %84 {offsets = [0, 0], sizes = [8, 192], strides = [1, 1]} : vector<8x256xf32> to vector<8x192xf32>
    %86 = arith.negf %85 : vector<8x192xf32>
    %87 = math.exp %86 : vector<8x192xf32>
    %cst_21 = arith.constant 1.000000e+00 : f32
    %88 = vector.broadcast %cst_21 : f32 to vector<8x192xf32>
    %89 = arith.addf %88, %87 : vector<8x192xf32>
    %90 = arith.divf %88, %89 : vector<8x192xf32>
    %91 = vector.extract_strided_slice %84 {offsets = [0, 192], sizes = [8, 64], strides = [1, 1]} : vector<8x256xf32> to vector<8x64xf32>
    %92 = math.tanh %91 : vector<8x64xf32>
    %93 = vector.extract_strided_slice %90 {offsets = [0, 0], sizes = [8, 64], strides = [1, 1]} : vector<8x192xf32> to vector<8x64xf32>
    %94 = vector.extract_strided_slice %90 {offsets = [0, 64], sizes = [8, 64], strides = [1, 1]} : vector<8x192xf32> to vector<8x64xf32>
    %95 = vector.extract_strided_slice %90 {offsets = [0, 128], sizes = [8, 64], strides = [1, 1]} : vector<8x192xf32> to vector<8x64xf32>
    %96 = arith.mulf %94, %72 : vector<8x64xf32>
    %97 = arith.mulf %93, %92 : vector<8x64xf32>
    %98 = arith.addf %96, %97 : vector<8x64xf32>
    %99 = math.tanh %98 : vector<8x64xf32>
    %100 = arith.mulf %95, %99 : vector<8x64xf32>
    %101 = arith.truncf %100 : vector<8x64xf32> to vector<8x64xbf16>
    %102 = vector.extract_strided_slice %100 {offsets = [0, 0], sizes = [8, 32], strides = [1, 1]} : vector<8x64xf32> to vector<8x32xf32>
    %c16 = arith.constant 16 : index
    %c0_22 = arith.constant 0 : index
    %103 = vector.load %arg10[%c16, %c0_22] : memref<64x64xf32, #tpu.memory_space<vmem>>, vector<8x32xf32>
    tpu.vector_store %arg10[%c16, %c0_22], %102 {strides = array<i32>} : memref<64x64xf32, #tpu.memory_space<vmem>>, vector<8x32xf32>,
    %104 = vector.extract_strided_slice %100 {offsets = [0, 32], sizes = [8, 32], strides = [1, 1]} : vector<8x64xf32> to vector<8x32xf32>
    %c40 = arith.constant 40 : index
    %c32_23 = arith.constant 32 : index
    %105 = vector.load %arg10[%c40, %c32_23] : memref<64x64xf32, #tpu.memory_space<vmem>>, vector<8x32xf32>
    tpu.vector_store %arg10[%c40, %c32_23], %104 {strides = array<i32>} : memref<64x64xf32, #tpu.memory_space<vmem>>, vector<8x32xf32>,
    %106 = vector.extract_strided_slice %24 {offsets = [24, 0], sizes = [8, 256], strides = [1, 1]} : vector<64x256xf32> to vector<8x256xf32>
    %107 = vector.extract_strided_slice %24 {offsets = [32, 0], sizes = [8, 256], strides = [1, 1]} : vector<64x256xf32> to vector<8x256xf32>
    %108 = arith.select %18, %106, %107 : vector<8x256xi1>, vector<8x256xf32>
    %cst_24 = arith.constant dense<0.000000e+00> : vector<8x256xf32>
    %109 = tpu.matmul %101, %25, %cst_24 {dimension_numbers = #tpu.dot_dimension_numbers<[1], [0], [0], [1], [0, 0, 1, 1], [], []>} : vector<8x64xbf16>, vector<64x256xbf16>, vector<8x256xf32> -> vector<8x256xf32>
    %110 = arith.addf %108, %109 : vector<8x256xf32>
    %111 = vector.extract_strided_slice %110 {offsets = [0, 0], sizes = [8, 192], strides = [1, 1]} : vector<8x256xf32> to vector<8x192xf32>
    %112 = arith.negf %111 : vector<8x192xf32>
    %113 = math.exp %112 : vector<8x192xf32>
    %cst_25 = arith.constant 1.000000e+00 : f32
    %114 = vector.broadcast %cst_25 : f32 to vector<8x192xf32>
    %115 = arith.addf %114, %113 : vector<8x192xf32>
    %116 = arith.divf %114, %115 : vector<8x192xf32>
    %117 = vector.extract_strided_slice %110 {offsets = [0, 192], sizes = [8, 64], strides = [1, 1]} : vector<8x256xf32> to vector<8x64xf32>
    %118 = math.tanh %117 : vector<8x64xf32>
    %119 = vector.extract_strided_slice %116 {offsets = [0, 0], sizes = [8, 64], strides = [1, 1]} : vector<8x192xf32> to vector<8x64xf32>
    %120 = vector.extract_strided_slice %116 {offsets = [0, 64], sizes = [8, 64], strides = [1, 1]} : vector<8x192xf32> to vector<8x64xf32>
    %121 = vector.extract_strided_slice %116 {offsets = [0, 128], sizes = [8, 64], strides = [1, 1]} : vector<8x192xf32> to vector<8x64xf32>
    %122 = arith.mulf %120, %98 : vector<8x64xf32>
    %123 = arith.mulf %119, %118 : vector<8x64xf32>
    %124 = arith.addf %122, %123 : vector<8x64xf32>
    %125 = math.tanh %124 : vector<8x64xf32>
    %126 = arith.mulf %121, %125 : vector<8x64xf32>
    %127 = arith.truncf %126 : vector<8x64xf32> to vector<8x64xbf16>
    %128 = vector.extract_strided_slice %126 {offsets = [0, 0], sizes = [8, 32], strides = [1, 1]} : vector<8x64xf32> to vector<8x32xf32>
    %c24 = arith.constant 24 : index
    %c0_26 = arith.constant 0 : index
    %129 = vector.load %arg10[%c24, %c0_26] : memref<64x64xf32, #tpu.memory_space<vmem>>, vector<8x32xf32>
    tpu.vector_store %arg10[%c24, %c0_26], %128 {strides = array<i32>} : memref<64x64xf32, #tpu.memory_space<vmem>>, vector<8x32xf32>,
    %130 = vector.extract_strided_slice %126 {offsets = [0, 32], sizes = [8, 32], strides = [1, 1]} : vector<8x64xf32> to vector<8x32xf32>
    %c32_27 = arith.constant 32 : index
    %c32_28 = arith.constant 32 : index
    %131 = vector.load %arg10[%c32_27, %c32_28] : memref<64x64xf32, #tpu.memory_space<vmem>>, vector<8x32xf32>
    tpu.vector_store %arg10[%c32_27, %c32_28], %130 {strides = array<i32>} : memref<64x64xf32, #tpu.memory_space<vmem>>, vector<8x32xf32>,
    %132 = vector.extract_strided_slice %24 {offsets = [32, 0], sizes = [8, 256], strides = [1, 1]} : vector<64x256xf32> to vector<8x256xf32>
    %133 = vector.extract_strided_slice %24 {offsets = [24, 0], sizes = [8, 256], strides = [1, 1]} : vector<64x256xf32> to vector<8x256xf32>
    %134 = arith.select %18, %132, %133 : vector<8x256xi1>, vector<8x256xf32>
    %cst_29 = arith.constant dense<0.000000e+00> : vector<8x256xf32>
    %135 = tpu.matmul %127, %25, %cst_29 {dimension_numbers = #tpu.dot_dimension_numbers<[1], [0], [0], [1], [0, 0, 1, 1], [], []>} : vector<8x64xbf16>, vector<64x256xbf16>, vector<8x256xf32> -> vector<8x256xf32>
    %136 = arith.addf %134, %135 : vector<8x256xf32>
    %137 = vector.extract_strided_slice %136 {offsets = [0, 0], sizes = [8, 192], strides = [1, 1]} : vector<8x256xf32> to vector<8x192xf32>
    %138 = arith.negf %137 : vector<8x192xf32>
    %139 = math.exp %138 : vector<8x192xf32>
    %cst_30 = arith.constant 1.000000e+00 : f32
    %140 = vector.broadcast %cst_30 : f32 to vector<8x192xf32>
    %141 = arith.addf %140, %139 : vector<8x192xf32>
    %142 = arith.divf %140, %141 : vector<8x192xf32>
    %143 = vector.extract_strided_slice %136 {offsets = [0, 192], sizes = [8, 64], strides = [1, 1]} : vector<8x256xf32> to vector<8x64xf32>
    %144 = math.tanh %143 : vector<8x64xf32>
    %145 = vector.extract_strided_slice %142 {offsets = [0, 0], sizes = [8, 64], strides = [1, 1]} : vector<8x192xf32> to vector<8x64xf32>
    %146 = vector.extract_strided_slice %142 {offsets = [0, 64], sizes = [8, 64], strides = [1, 1]} : vector<8x192xf32> to vector<8x64xf32>
    %147 = vector.extract_strided_slice %142 {offsets = [0, 128], sizes = [8, 64], strides = [1, 1]} : vector<8x192xf32> to vector<8x64xf32>
    %148 = arith.mulf %146, %124 : vector<8x64xf32>
    %149 = arith.mulf %145, %144 : vector<8x64xf32>
    %150 = arith.addf %148, %149 : vector<8x64xf32>
    %151 = math.tanh %150 : vector<8x64xf32>
    %152 = arith.mulf %147, %151 : vector<8x64xf32>
    %153 = arith.truncf %152 : vector<8x64xf32> to vector<8x64xbf16>
    %154 = vector.extract_strided_slice %152 {offsets = [0, 0], sizes = [8, 32], strides = [1, 1]} : vector<8x64xf32> to vector<8x32xf32>
    %c32_31 = arith.constant 32 : index
    %c0_32 = arith.constant 0 : index
    %155 = vector.load %arg10[%c32_31, %c0_32] : memref<64x64xf32, #tpu.memory_space<vmem>>, vector<8x32xf32>
    tpu.vector_store %arg10[%c32_31, %c0_32], %154 {strides = array<i32>} : memref<64x64xf32, #tpu.memory_space<vmem>>, vector<8x32xf32>,
    %156 = vector.extract_strided_slice %152 {offsets = [0, 32], sizes = [8, 32], strides = [1, 1]} : vector<8x64xf32> to vector<8x32xf32>
    %c24_33 = arith.constant 24 : index
    %c32_34 = arith.constant 32 : index
    %157 = vector.load %arg10[%c24_33, %c32_34] : memref<64x64xf32, #tpu.memory_space<vmem>>, vector<8x32xf32>
    tpu.vector_store %arg10[%c24_33, %c32_34], %156 {strides = array<i32>} : memref<64x64xf32, #tpu.memory_space<vmem>>, vector<8x32xf32>,
    %158 = vector.extract_strided_slice %24 {offsets = [40, 0], sizes = [8, 256], strides = [1, 1]} : vector<64x256xf32> to vector<8x256xf32>
    %159 = vector.extract_strided_slice %24 {offsets = [16, 0], sizes = [8, 256], strides = [1, 1]} : vector<64x256xf32> to vector<8x256xf32>
    %160 = arith.select %18, %158, %159 : vector<8x256xi1>, vector<8x256xf32>
    %cst_35 = arith.constant dense<0.000000e+00> : vector<8x256xf32>
    %161 = tpu.matmul %153, %25, %cst_35 {dimension_numbers = #tpu.dot_dimension_numbers<[1], [0], [0], [1], [0, 0, 1, 1], [], []>} : vector<8x64xbf16>, vector<64x256xbf16>, vector<8x256xf32> -> vector<8x256xf32>
    %162 = arith.addf %160, %161 : vector<8x256xf32>
    %163 = vector.extract_strided_slice %162 {offsets = [0, 0], sizes = [8, 192], strides = [1, 1]} : vector<8x256xf32> to vector<8x192xf32>
    %164 = arith.negf %163 : vector<8x192xf32>
    %165 = math.exp %164 : vector<8x192xf32>
    %cst_36 = arith.constant 1.000000e+00 : f32
    %166 = vector.broadcast %cst_36 : f32 to vector<8x192xf32>
    %167 = arith.addf %166, %165 : vector<8x192xf32>
    %168 = arith.divf %166, %167 : vector<8x192xf32>
    %169 = vector.extract_strided_slice %162 {offsets = [0, 192], sizes = [8, 64], strides = [1, 1]} : vector<8x256xf32> to vector<8x64xf32>
    %170 = math.tanh %169 : vector<8x64xf32>
    %171 = vector.extract_strided_slice %168 {offsets = [0, 0], sizes = [8, 64], strides = [1, 1]} : vector<8x192xf32> to vector<8x64xf32>
    %172 = vector.extract_strided_slice %168 {offsets = [0, 64], sizes = [8, 64], strides = [1, 1]} : vector<8x192xf32> to vector<8x64xf32>
    %173 = vector.extract_strided_slice %168 {offsets = [0, 128], sizes = [8, 64], strides = [1, 1]} : vector<8x192xf32> to vector<8x64xf32>
    %174 = arith.mulf %172, %150 : vector<8x64xf32>
    %175 = arith.mulf %171, %170 : vector<8x64xf32>
    %176 = arith.addf %174, %175 : vector<8x64xf32>
    %177 = math.tanh %176 : vector<8x64xf32>
    %178 = arith.mulf %173, %177 : vector<8x64xf32>
    %179 = arith.truncf %178 : vector<8x64xf32> to vector<8x64xbf16>
    %180 = vector.extract_strided_slice %178 {offsets = [0, 0], sizes = [8, 32], strides = [1, 1]} : vector<8x64xf32> to vector<8x32xf32>
    %c40_37 = arith.constant 40 : index
    %c0_38 = arith.constant 0 : index
    %181 = vector.load %arg10[%c40_37, %c0_38] : memref<64x64xf32, #tpu.memory_space<vmem>>, vector<8x32xf32>
    tpu.vector_store %arg10[%c40_37, %c0_38], %180 {strides = array<i32>} : memref<64x64xf32, #tpu.memory_space<vmem>>, vector<8x32xf32>,
    %182 = vector.extract_strided_slice %178 {offsets = [0, 32], sizes = [8, 32], strides = [1, 1]} : vector<8x64xf32> to vector<8x32xf32>
    %c16_39 = arith.constant 16 : index
    %c32_40 = arith.constant 32 : index
    %183 = vector.load %arg10[%c16_39, %c32_40] : memref<64x64xf32, #tpu.memory_space<vmem>>, vector<8x32xf32>
    tpu.vector_store %arg10[%c16_39, %c32_40], %182 {strides = array<i32>} : memref<64x64xf32, #tpu.memory_space<vmem>>, vector<8x32xf32>,
    %184 = vector.extract_strided_slice %24 {offsets = [48, 0], sizes = [8, 256], strides = [1, 1]} : vector<64x256xf32> to vector<8x256xf32>
    %185 = vector.extract_strided_slice %24 {offsets = [8, 0], sizes = [8, 256], strides = [1, 1]} : vector<64x256xf32> to vector<8x256xf32>
    %186 = arith.select %18, %184, %185 : vector<8x256xi1>, vector<8x256xf32>
    %cst_41 = arith.constant dense<0.000000e+00> : vector<8x256xf32>
    %187 = tpu.matmul %179, %25, %cst_41 {dimension_numbers = #tpu.dot_dimension_numbers<[1], [0], [0], [1], [0, 0, 1, 1], [], []>} : vector<8x64xbf16>, vector<64x256xbf16>, vector<8x256xf32> -> vector<8x256xf32>
    %188 = arith.addf %186, %187 : vector<8x256xf32>
    %189 = vector.extract_strided_slice %188 {offsets = [0, 0], sizes = [8, 192], strides = [1, 1]} : vector<8x256xf32> to vector<8x192xf32>
    %190 = arith.negf %189 : vector<8x192xf32>
    %191 = math.exp %190 : vector<8x192xf32>
    %cst_42 = arith.constant 1.000000e+00 : f32
    %192 = vector.broadcast %cst_42 : f32 to vector<8x192xf32>
    %193 = arith.addf %192, %191 : vector<8x192xf32>
    %194 = arith.divf %192, %193 : vector<8x192xf32>
    %195 = vector.extract_strided_slice %188 {offsets = [0, 192], sizes = [8, 64], strides = [1, 1]} : vector<8x256xf32> to vector<8x64xf32>
    %196 = math.tanh %195 : vector<8x64xf32>
    %197 = vector.extract_strided_slice %194 {offsets = [0, 0], sizes = [8, 64], strides = [1, 1]} : vector<8x192xf32> to vector<8x64xf32>
    %198 = vector.extract_strided_slice %194 {offsets = [0, 64], sizes = [8, 64], strides = [1, 1]} : vector<8x192xf32> to vector<8x64xf32>
    %199 = vector.extract_strided_slice %194 {offsets = [0, 128], sizes = [8, 64], strides = [1, 1]} : vector<8x192xf32> to vector<8x64xf32>
    %200 = arith.mulf %198, %176 : vector<8x64xf32>
    %201 = arith.mulf %197, %196 : vector<8x64xf32>
    %202 = arith.addf %200, %201 : vector<8x64xf32>
    %203 = math.tanh %202 : vector<8x64xf32>
    %204 = arith.mulf %199, %203 : vector<8x64xf32>
    %205 = arith.truncf %204 : vector<8x64xf32> to vector<8x64xbf16>
    %206 = vector.extract_strided_slice %204 {offsets = [0, 0], sizes = [8, 32], strides = [1, 1]} : vector<8x64xf32> to vector<8x32xf32>
    %c48_43 = arith.constant 48 : index
    %c0_44 = arith.constant 0 : index
    %207 = vector.load %arg10[%c48_43, %c0_44] : memref<64x64xf32, #tpu.memory_space<vmem>>, vector<8x32xf32>
    tpu.vector_store %arg10[%c48_43, %c0_44], %206 {strides = array<i32>} : memref<64x64xf32, #tpu.memory_space<vmem>>, vector<8x32xf32>,
    %208 = vector.extract_strided_slice %204 {offsets = [0, 32], sizes = [8, 32], strides = [1, 1]} : vector<8x64xf32> to vector<8x32xf32>
    %c8_45 = arith.constant 8 : index
    %c32_46 = arith.constant 32 : index
    %209 = vector.load %arg10[%c8_45, %c32_46] : memref<64x64xf32, #tpu.memory_space<vmem>>, vector<8x32xf32>
    tpu.vector_store %arg10[%c8_45, %c32_46], %208 {strides = array<i32>} : memref<64x64xf32, #tpu.memory_space<vmem>>, vector<8x32xf32>,
    %210 = vector.extract_strided_slice %24 {offsets = [56, 0], sizes = [8, 256], strides = [1, 1]} : vector<64x256xf32> to vector<8x256xf32>
    %211 = vector.extract_strided_slice %24 {offsets = [0, 0], sizes = [8, 256], strides = [1, 1]} : vector<64x256xf32> to vector<8x256xf32>
    %212 = arith.select %18, %210, %211 : vector<8x256xi1>, vector<8x256xf32>
    %cst_47 = arith.constant dense<0.000000e+00> : vector<8x256xf32>
    %213 = tpu.matmul %205, %25, %cst_47 {dimension_numbers = #tpu.dot_dimension_numbers<[1], [0], [0], [1], [0, 0, 1, 1], [], []>} : vector<8x64xbf16>, vector<64x256xbf16>, vector<8x256xf32> -> vector<8x256xf32>
    %214 = arith.addf %212, %213 : vector<8x256xf32>
    %215 = vector.extract_strided_slice %214 {offsets = [0, 0], sizes = [8, 192], strides = [1, 1]} : vector<8x256xf32> to vector<8x192xf32>
    %216 = arith.negf %215 : vector<8x192xf32>
    %217 = math.exp %216 : vector<8x192xf32>
    %cst_48 = arith.constant 1.000000e+00 : f32
    %218 = vector.broadcast %cst_48 : f32 to vector<8x192xf32>
    %219 = arith.addf %218, %217 : vector<8x192xf32>
    %220 = arith.divf %218, %219 : vector<8x192xf32>
    %221 = vector.extract_strided_slice %214 {offsets = [0, 192], sizes = [8, 64], strides = [1, 1]} : vector<8x256xf32> to vector<8x64xf32>
    %222 = math.tanh %221 : vector<8x64xf32>
    %223 = vector.extract_strided_slice %220 {offsets = [0, 0], sizes = [8, 64], strides = [1, 1]} : vector<8x192xf32> to vector<8x64xf32>
    %224 = vector.extract_strided_slice %220 {offsets = [0, 64], sizes = [8, 64], strides = [1, 1]} : vector<8x192xf32> to vector<8x64xf32>
    %225 = vector.extract_strided_slice %220 {offsets = [0, 128], sizes = [8, 64], strides = [1, 1]} : vector<8x192xf32> to vector<8x64xf32>
    %226 = arith.mulf %224, %202 : vector<8x64xf32>
    %227 = arith.mulf %223, %222 : vector<8x64xf32>
    %228 = arith.addf %226, %227 : vector<8x64xf32>
    %229 = math.tanh %228 : vector<8x64xf32>
    %230 = arith.mulf %225, %229 : vector<8x64xf32>
    %231 = vector.extract_strided_slice %230 {offsets = [0, 0], sizes = [8, 32], strides = [1, 1]} : vector<8x64xf32> to vector<8x32xf32>
    %c56_49 = arith.constant 56 : index
    %c0_50 = arith.constant 0 : index
    %232 = vector.load %arg10[%c56_49, %c0_50] : memref<64x64xf32, #tpu.memory_space<vmem>>, vector<8x32xf32>
    tpu.vector_store %arg10[%c56_49, %c0_50], %231 {strides = array<i32>} : memref<64x64xf32, #tpu.memory_space<vmem>>, vector<8x32xf32>,
    %233 = vector.extract_strided_slice %230 {offsets = [0, 32], sizes = [8, 32], strides = [1, 1]} : vector<8x64xf32> to vector<8x32xf32>
    %c0_51 = arith.constant 0 : index
    %c32_52 = arith.constant 32 : index
    %234 = vector.load %arg10[%c0_51, %c32_52] : memref<64x64xf32, #tpu.memory_space<vmem>>, vector<8x32xf32>
    tpu.vector_store %arg10[%c0_51, %c32_52], %233 {strides = array<i32>} : memref<64x64xf32, #tpu.memory_space<vmem>>, vector<8x32xf32>,
    %c0_53 = arith.constant 0 : index
    %c0_54 = arith.constant 0 : index
    %235 = vector.load %arg10[%c0_53, %c0_54] : memref<64x64xf32, #tpu.memory_space<vmem>>, vector<64x64xf32>
    %236 = arith.truncf %235 : vector<64x64xf32> to vector<64x64xbf16>
    %c0_55 = arith.constant 0 : index
    %c0_56 = arith.constant 0 : index
    %237 = vector.load %arg4[%c0_55, %c0_56] : memref<64x256xbf16, #tpu.memory_space<vmem>>, vector<64x256xbf16>
    %cst_57 = arith.constant dense<0.000000e+00> : vector<64x256xf32>
    %238 = tpu.matmul %236, %237, %cst_57 {dimension_numbers = #tpu.dot_dimension_numbers<[1], [0], [0], [1], [0, 0, 1, 1], [], []>} : vector<64x64xbf16>, vector<64x256xbf16>, vector<64x256xf32> -> vector<64x256xf32>
    %c0_58 = arith.constant 0 : index
    %c0_59 = arith.constant 0 : index
    %239 = vector.load %arg6[%c0_58, %c0_59] : memref<1x256xf32, #tpu.memory_space<vmem>>, vector<1x256xf32>
    %240 = vector.broadcast %239 : vector<1x256xf32> to vector<64x256xf32>
    %241 = arith.addf %238, %240 : vector<64x256xf32>
    %c0_60 = arith.constant 0 : index
    %c0_61 = arith.constant 0 : index
    %242 = vector.load %arg5[%c0_60, %c0_61] : memref<64x256xbf16, #tpu.memory_space<vmem>>, vector<64x256xbf16>
    %cst_62 = arith.constant 0.000000e+00 : f32
    %243 = vector.broadcast %cst_62 : f32 to vector<8x64xf32>
    %cst_63 = arith.constant 0.000000e+00 : bf16
    %244 = vector.broadcast %cst_63 : bf16 to vector<8x64xbf16>
    %245 = vector.extract_strided_slice %241 {offsets = [0, 0], sizes = [8, 256], strides = [1, 1]} : vector<64x256xf32> to vector<8x256xf32>
    %246 = vector.extract_strided_slice %241 {offsets = [56, 0], sizes = [8, 256], strides = [1, 1]} : vector<64x256xf32> to vector<8x256xf32>
    %247 = arith.select %18, %245, %246 : vector<8x256xi1>, vector<8x256xf32>
    %cst_64 = arith.constant dense<0.000000e+00> : vector<8x256xf32>
    %248 = tpu.matmul %244, %242, %cst_64 {dimension_numbers = #tpu.dot_dimension_numbers<[1], [0], [0], [1], [0, 0, 1, 1], [], []>} : vector<8x64xbf16>, vector<64x256xbf16>, vector<8x256xf32> -> vector<8x256xf32>
    %249 = arith.addf %247, %248 : vector<8x256xf32>
    %250 = vector.extract_strided_slice %249 {offsets = [0, 0], sizes = [8, 192], strides = [1, 1]} : vector<8x256xf32> to vector<8x192xf32>
    %251 = arith.negf %250 : vector<8x192xf32>
    %252 = math.exp %251 : vector<8x192xf32>
    %cst_65 = arith.constant 1.000000e+00 : f32
    %253 = vector.broadcast %cst_65 : f32 to vector<8x192xf32>
    %254 = arith.addf %253, %252 : vector<8x192xf32>
    %255 = arith.divf %253, %254 : vector<8x192xf32>
    %256 = vector.extract_strided_slice %249 {offsets = [0, 192], sizes = [8, 64], strides = [1, 1]} : vector<8x256xf32> to vector<8x64xf32>
    %257 = math.tanh %256 : vector<8x64xf32>
    %258 = vector.extract_strided_slice %255 {offsets = [0, 0], sizes = [8, 64], strides = [1, 1]} : vector<8x192xf32> to vector<8x64xf32>
    %259 = vector.extract_strided_slice %255 {offsets = [0, 64], sizes = [8, 64], strides = [1, 1]} : vector<8x192xf32> to vector<8x64xf32>
    %260 = vector.extract_strided_slice %255 {offsets = [0, 128], sizes = [8, 64], strides = [1, 1]} : vector<8x192xf32> to vector<8x64xf32>
    %261 = arith.mulf %259, %243 : vector<8x64xf32>
    %262 = arith.mulf %258, %257 : vector<8x64xf32>
    %263 = arith.addf %261, %262 : vector<8x64xf32>
    %264 = math.tanh %263 : vector<8x64xf32>
    %265 = arith.mulf %260, %264 : vector<8x64xf32>
    %266 = arith.truncf %265 : vector<8x64xf32> to vector<8x64xbf16>
    %267 = vector.extract_strided_slice %265 {offsets = [0, 0], sizes = [8, 32], strides = [1, 1]} : vector<8x64xf32> to vector<8x32xf32>
    %c0_66 = arith.constant 0 : index
    %c0_67 = arith.constant 0 : index
    %268 = vector.load %arg10[%c0_66, %c0_67] : memref<64x64xf32, #tpu.memory_space<vmem>>, vector<8x32xf32>
    tpu.vector_store %arg10[%c0_66, %c0_67], %267 {strides = array<i32>} : memref<64x64xf32, #tpu.memory_space<vmem>>, vector<8x32xf32>,
    %269 = vector.extract_strided_slice %265 {offsets = [0, 32], sizes = [8, 32], strides = [1, 1]} : vector<8x64xf32> to vector<8x32xf32>
    %c56_68 = arith.constant 56 : index
    %c32_69 = arith.constant 32 : index
    %270 = vector.load %arg10[%c56_68, %c32_69] : memref<64x64xf32, #tpu.memory_space<vmem>>, vector<8x32xf32>
    tpu.vector_store %arg10[%c56_68, %c32_69], %269 {strides = array<i32>} : memref<64x64xf32, #tpu.memory_space<vmem>>, vector<8x32xf32>,
    %271 = vector.extract_strided_slice %241 {offsets = [8, 0], sizes = [8, 256], strides = [1, 1]} : vector<64x256xf32> to vector<8x256xf32>
    %272 = vector.extract_strided_slice %241 {offsets = [48, 0], sizes = [8, 256], strides = [1, 1]} : vector<64x256xf32> to vector<8x256xf32>
    %273 = arith.select %18, %271, %272 : vector<8x256xi1>, vector<8x256xf32>
    %cst_70 = arith.constant dense<0.000000e+00> : vector<8x256xf32>
    %274 = tpu.matmul %266, %242, %cst_70 {dimension_numbers = #tpu.dot_dimension_numbers<[1], [0], [0], [1], [0, 0, 1, 1], [], []>} : vector<8x64xbf16>, vector<64x256xbf16>, vector<8x256xf32> -> vector<8x256xf32>
    %275 = arith.addf %273, %274 : vector<8x256xf32>
    %276 = vector.extract_strided_slice %275 {offsets = [0, 0], sizes = [8, 192], strides = [1, 1]} : vector<8x256xf32> to vector<8x192xf32>
    %277 = arith.negf %276 : vector<8x192xf32>
    %278 = math.exp %277 : vector<8x192xf32>
    %cst_71 = arith.constant 1.000000e+00 : f32
    %279 = vector.broadcast %cst_71 : f32 to vector<8x192xf32>
    %280 = arith.addf %279, %278 : vector<8x192xf32>
    %281 = arith.divf %279, %280 : vector<8x192xf32>
    %282 = vector.extract_strided_slice %275 {offsets = [0, 192], sizes = [8, 64], strides = [1, 1]} : vector<8x256xf32> to vector<8x64xf32>
    %283 = math.tanh %282 : vector<8x64xf32>
    %284 = vector.extract_strided_slice %281 {offsets = [0, 0], sizes = [8, 64], strides = [1, 1]} : vector<8x192xf32> to vector<8x64xf32>
    %285 = vector.extract_strided_slice %281 {offsets = [0, 64], sizes = [8, 64], strides = [1, 1]} : vector<8x192xf32> to vector<8x64xf32>
    %286 = vector.extract_strided_slice %281 {offsets = [0, 128], sizes = [8, 64], strides = [1, 1]} : vector<8x192xf32> to vector<8x64xf32>
    %287 = arith.mulf %285, %263 : vector<8x64xf32>
    %288 = arith.mulf %284, %283 : vector<8x64xf32>
    %289 = arith.addf %287, %288 : vector<8x64xf32>
    %290 = math.tanh %289 : vector<8x64xf32>
    %291 = arith.mulf %286, %290 : vector<8x64xf32>
    %292 = arith.truncf %291 : vector<8x64xf32> to vector<8x64xbf16>
    %293 = vector.extract_strided_slice %291 {offsets = [0, 0], sizes = [8, 32], strides = [1, 1]} : vector<8x64xf32> to vector<8x32xf32>
    %c8_72 = arith.constant 8 : index
    %c0_73 = arith.constant 0 : index
    %294 = vector.load %arg10[%c8_72, %c0_73] : memref<64x64xf32, #tpu.memory_space<vmem>>, vector<8x32xf32>
    tpu.vector_store %arg10[%c8_72, %c0_73], %293 {strides = array<i32>} : memref<64x64xf32, #tpu.memory_space<vmem>>, vector<8x32xf32>,
    %295 = vector.extract_strided_slice %291 {offsets = [0, 32], sizes = [8, 32], strides = [1, 1]} : vector<8x64xf32> to vector<8x32xf32>
    %c48_74 = arith.constant 48 : index
    %c32_75 = arith.constant 32 : index
    %296 = vector.load %arg10[%c48_74, %c32_75] : memref<64x64xf32, #tpu.memory_space<vmem>>, vector<8x32xf32>
    tpu.vector_store %arg10[%c48_74, %c32_75], %295 {strides = array<i32>} : memref<64x64xf32, #tpu.memory_space<vmem>>, vector<8x32xf32>,
    %297 = vector.extract_strided_slice %241 {offsets = [16, 0], sizes = [8, 256], strides = [1, 1]} : vector<64x256xf32> to vector<8x256xf32>
    %298 = vector.extract_strided_slice %241 {offsets = [40, 0], sizes = [8, 256], strides = [1, 1]} : vector<64x256xf32> to vector<8x256xf32>
    %299 = arith.select %18, %297, %298 : vector<8x256xi1>, vector<8x256xf32>
    %cst_76 = arith.constant dense<0.000000e+00> : vector<8x256xf32>
    %300 = tpu.matmul %292, %242, %cst_76 {dimension_numbers = #tpu.dot_dimension_numbers<[1], [0], [0], [1], [0, 0, 1, 1], [], []>} : vector<8x64xbf16>, vector<64x256xbf16>, vector<8x256xf32> -> vector<8x256xf32>
    %301 = arith.addf %299, %300 : vector<8x256xf32>
    %302 = vector.extract_strided_slice %301 {offsets = [0, 0], sizes = [8, 192], strides = [1, 1]} : vector<8x256xf32> to vector<8x192xf32>
    %303 = arith.negf %302 : vector<8x192xf32>
    %304 = math.exp %303 : vector<8x192xf32>
    %cst_77 = arith.constant 1.000000e+00 : f32
    %305 = vector.broadcast %cst_77 : f32 to vector<8x192xf32>
    %306 = arith.addf %305, %304 : vector<8x192xf32>
    %307 = arith.divf %305, %306 : vector<8x192xf32>
    %308 = vector.extract_strided_slice %301 {offsets = [0, 192], sizes = [8, 64], strides = [1, 1]} : vector<8x256xf32> to vector<8x64xf32>
    %309 = math.tanh %308 : vector<8x64xf32>
    %310 = vector.extract_strided_slice %307 {offsets = [0, 0], sizes = [8, 64], strides = [1, 1]} : vector<8x192xf32> to vector<8x64xf32>
    %311 = vector.extract_strided_slice %307 {offsets = [0, 64], sizes = [8, 64], strides = [1, 1]} : vector<8x192xf32> to vector<8x64xf32>
    %312 = vector.extract_strided_slice %307 {offsets = [0, 128], sizes = [8, 64], strides = [1, 1]} : vector<8x192xf32> to vector<8x64xf32>
    %313 = arith.mulf %311, %289 : vector<8x64xf32>
    %314 = arith.mulf %310, %309 : vector<8x64xf32>
    %315 = arith.addf %313, %314 : vector<8x64xf32>
    %316 = math.tanh %315 : vector<8x64xf32>
    %317 = arith.mulf %312, %316 : vector<8x64xf32>
    %318 = arith.truncf %317 : vector<8x64xf32> to vector<8x64xbf16>
    %319 = vector.extract_strided_slice %317 {offsets = [0, 0], sizes = [8, 32], strides = [1, 1]} : vector<8x64xf32> to vector<8x32xf32>
    %c16_78 = arith.constant 16 : index
    %c0_79 = arith.constant 0 : index
    %320 = vector.load %arg10[%c16_78, %c0_79] : memref<64x64xf32, #tpu.memory_space<vmem>>, vector<8x32xf32>
    tpu.vector_store %arg10[%c16_78, %c0_79], %319 {strides = array<i32>} : memref<64x64xf32, #tpu.memory_space<vmem>>, vector<8x32xf32>,
    %321 = vector.extract_strided_slice %317 {offsets = [0, 32], sizes = [8, 32], strides = [1, 1]} : vector<8x64xf32> to vector<8x32xf32>
    %c40_80 = arith.constant 40 : index
    %c32_81 = arith.constant 32 : index
    %322 = vector.load %arg10[%c40_80, %c32_81] : memref<64x64xf32, #tpu.memory_space<vmem>>, vector<8x32xf32>
    tpu.vector_store %arg10[%c40_80, %c32_81], %321 {strides = array<i32>} : memref<64x64xf32, #tpu.memory_space<vmem>>, vector<8x32xf32>,
    %323 = vector.extract_strided_slice %241 {offsets = [24, 0], sizes = [8, 256], strides = [1, 1]} : vector<64x256xf32> to vector<8x256xf32>
    %324 = vector.extract_strided_slice %241 {offsets = [32, 0], sizes = [8, 256], strides = [1, 1]} : vector<64x256xf32> to vector<8x256xf32>
    %325 = arith.select %18, %323, %324 : vector<8x256xi1>, vector<8x256xf32>
    %cst_82 = arith.constant dense<0.000000e+00> : vector<8x256xf32>
    %326 = tpu.matmul %318, %242, %cst_82 {dimension_numbers = #tpu.dot_dimension_numbers<[1], [0], [0], [1], [0, 0, 1, 1], [], []>} : vector<8x64xbf16>, vector<64x256xbf16>, vector<8x256xf32> -> vector<8x256xf32>
    %327 = arith.addf %325, %326 : vector<8x256xf32>
    %328 = vector.extract_strided_slice %327 {offsets = [0, 0], sizes = [8, 192], strides = [1, 1]} : vector<8x256xf32> to vector<8x192xf32>
    %329 = arith.negf %328 : vector<8x192xf32>
    %330 = math.exp %329 : vector<8x192xf32>
    %cst_83 = arith.constant 1.000000e+00 : f32
    %331 = vector.broadcast %cst_83 : f32 to vector<8x192xf32>
    %332 = arith.addf %331, %330 : vector<8x192xf32>
    %333 = arith.divf %331, %332 : vector<8x192xf32>
    %334 = vector.extract_strided_slice %327 {offsets = [0, 192], sizes = [8, 64], strides = [1, 1]} : vector<8x256xf32> to vector<8x64xf32>
    %335 = math.tanh %334 : vector<8x64xf32>
    %336 = vector.extract_strided_slice %333 {offsets = [0, 0], sizes = [8, 64], strides = [1, 1]} : vector<8x192xf32> to vector<8x64xf32>
    %337 = vector.extract_strided_slice %333 {offsets = [0, 64], sizes = [8, 64], strides = [1, 1]} : vector<8x192xf32> to vector<8x64xf32>
    %338 = vector.extract_strided_slice %333 {offsets = [0, 128], sizes = [8, 64], strides = [1, 1]} : vector<8x192xf32> to vector<8x64xf32>
    %339 = arith.mulf %337, %315 : vector<8x64xf32>
    %340 = arith.mulf %336, %335 : vector<8x64xf32>
    %341 = arith.addf %339, %340 : vector<8x64xf32>
    %342 = math.tanh %341 : vector<8x64xf32>
    %343 = arith.mulf %338, %342 : vector<8x64xf32>
    %344 = arith.truncf %343 : vector<8x64xf32> to vector<8x64xbf16>
    %345 = vector.extract_strided_slice %343 {offsets = [0, 0], sizes = [8, 32], strides = [1, 1]} : vector<8x64xf32> to vector<8x32xf32>
    %c24_84 = arith.constant 24 : index
    %c0_85 = arith.constant 0 : index
    %346 = vector.load %arg10[%c24_84, %c0_85] : memref<64x64xf32, #tpu.memory_space<vmem>>, vector<8x32xf32>
    tpu.vector_store %arg10[%c24_84, %c0_85], %345 {strides = array<i32>} : memref<64x64xf32, #tpu.memory_space<vmem>>, vector<8x32xf32>,
    %347 = vector.extract_strided_slice %343 {offsets = [0, 32], sizes = [8, 32], strides = [1, 1]} : vector<8x64xf32> to vector<8x32xf32>
    %c32_86 = arith.constant 32 : index
    %c32_87 = arith.constant 32 : index
    %348 = vector.load %arg10[%c32_86, %c32_87] : memref<64x64xf32, #tpu.memory_space<vmem>>, vector<8x32xf32>
    tpu.vector_store %arg10[%c32_86, %c32_87], %347 {strides = array<i32>} : memref<64x64xf32, #tpu.memory_space<vmem>>, vector<8x32xf32>,
    %349 = vector.extract_strided_slice %241 {offsets = [32, 0], sizes = [8, 256], strides = [1, 1]} : vector<64x256xf32> to vector<8x256xf32>
    %350 = vector.extract_strided_slice %241 {offsets = [24, 0], sizes = [8, 256], strides = [1, 1]} : vector<64x256xf32> to vector<8x256xf32>
    %351 = arith.select %18, %349, %350 : vector<8x256xi1>, vector<8x256xf32>
    %cst_88 = arith.constant dense<0.000000e+00> : vector<8x256xf32>
    %352 = tpu.matmul %344, %242, %cst_88 {dimension_numbers = #tpu.dot_dimension_numbers<[1], [0], [0], [1], [0, 0, 1, 1], [], []>} : vector<8x64xbf16>, vector<64x256xbf16>, vector<8x256xf32> -> vector<8x256xf32>
    %353 = arith.addf %351, %352 : vector<8x256xf32>
    %354 = vector.extract_strided_slice %353 {offsets = [0, 0], sizes = [8, 192], strides = [1, 1]} : vector<8x256xf32> to vector<8x192xf32>
    %355 = arith.negf %354 : vector<8x192xf32>
    %356 = math.exp %355 : vector<8x192xf32>
    %cst_89 = arith.constant 1.000000e+00 : f32
    %357 = vector.broadcast %cst_89 : f32 to vector<8x192xf32>
    %358 = arith.addf %357, %356 : vector<8x192xf32>
    %359 = arith.divf %357, %358 : vector<8x192xf32>
    %360 = vector.extract_strided_slice %353 {offsets = [0, 192], sizes = [8, 64], strides = [1, 1]} : vector<8x256xf32> to vector<8x64xf32>
    %361 = math.tanh %360 : vector<8x64xf32>
    %362 = vector.extract_strided_slice %359 {offsets = [0, 0], sizes = [8, 64], strides = [1, 1]} : vector<8x192xf32> to vector<8x64xf32>
    %363 = vector.extract_strided_slice %359 {offsets = [0, 64], sizes = [8, 64], strides = [1, 1]} : vector<8x192xf32> to vector<8x64xf32>
    %364 = vector.extract_strided_slice %359 {offsets = [0, 128], sizes = [8, 64], strides = [1, 1]} : vector<8x192xf32> to vector<8x64xf32>
    %365 = arith.mulf %363, %341 : vector<8x64xf32>
    %366 = arith.mulf %362, %361 : vector<8x64xf32>
    %367 = arith.addf %365, %366 : vector<8x64xf32>
    %368 = math.tanh %367 : vector<8x64xf32>
    %369 = arith.mulf %364, %368 : vector<8x64xf32>
    %370 = arith.truncf %369 : vector<8x64xf32> to vector<8x64xbf16>
    %371 = vector.extract_strided_slice %369 {offsets = [0, 0], sizes = [8, 32], strides = [1, 1]} : vector<8x64xf32> to vector<8x32xf32>
    %c32_90 = arith.constant 32 : index
    %c0_91 = arith.constant 0 : index
    %372 = vector.load %arg10[%c32_90, %c0_91] : memref<64x64xf32, #tpu.memory_space<vmem>>, vector<8x32xf32>
    tpu.vector_store %arg10[%c32_90, %c0_91], %371 {strides = array<i32>} : memref<64x64xf32, #tpu.memory_space<vmem>>, vector<8x32xf32>,
    %373 = vector.extract_strided_slice %369 {offsets = [0, 32], sizes = [8, 32], strides = [1, 1]} : vector<8x64xf32> to vector<8x32xf32>
    %c24_92 = arith.constant 24 : index
    %c32_93 = arith.constant 32 : index
    %374 = vector.load %arg10[%c24_92, %c32_93] : memref<64x64xf32, #tpu.memory_space<vmem>>, vector<8x32xf32>
    tpu.vector_store %arg10[%c24_92, %c32_93], %373 {strides = array<i32>} : memref<64x64xf32, #tpu.memory_space<vmem>>, vector<8x32xf32>,
    %375 = vector.extract_strided_slice %241 {offsets = [40, 0], sizes = [8, 256], strides = [1, 1]} : vector<64x256xf32> to vector<8x256xf32>
    %376 = vector.extract_strided_slice %241 {offsets = [16, 0], sizes = [8, 256], strides = [1, 1]} : vector<64x256xf32> to vector<8x256xf32>
    %377 = arith.select %18, %375, %376 : vector<8x256xi1>, vector<8x256xf32>
    %cst_94 = arith.constant dense<0.000000e+00> : vector<8x256xf32>
    %378 = tpu.matmul %370, %242, %cst_94 {dimension_numbers = #tpu.dot_dimension_numbers<[1], [0], [0], [1], [0, 0, 1, 1], [], []>} : vector<8x64xbf16>, vector<64x256xbf16>, vector<8x256xf32> -> vector<8x256xf32>
    %379 = arith.addf %377, %378 : vector<8x256xf32>
    %380 = vector.extract_strided_slice %379 {offsets = [0, 0], sizes = [8, 192], strides = [1, 1]} : vector<8x256xf32> to vector<8x192xf32>
    %381 = arith.negf %380 : vector<8x192xf32>
    %382 = math.exp %381 : vector<8x192xf32>
    %cst_95 = arith.constant 1.000000e+00 : f32
    %383 = vector.broadcast %cst_95 : f32 to vector<8x192xf32>
    %384 = arith.addf %383, %382 : vector<8x192xf32>
    %385 = arith.divf %383, %384 : vector<8x192xf32>
    %386 = vector.extract_strided_slice %379 {offsets = [0, 192], sizes = [8, 64], strides = [1, 1]} : vector<8x256xf32> to vector<8x64xf32>
    %387 = math.tanh %386 : vector<8x64xf32>
    %388 = vector.extract_strided_slice %385 {offsets = [0, 0], sizes = [8, 64], strides = [1, 1]} : vector<8x192xf32> to vector<8x64xf32>
    %389 = vector.extract_strided_slice %385 {offsets = [0, 64], sizes = [8, 64], strides = [1, 1]} : vector<8x192xf32> to vector<8x64xf32>
    %390 = vector.extract_strided_slice %385 {offsets = [0, 128], sizes = [8, 64], strides = [1, 1]} : vector<8x192xf32> to vector<8x64xf32>
    %391 = arith.mulf %389, %367 : vector<8x64xf32>
    %392 = arith.mulf %388, %387 : vector<8x64xf32>
    %393 = arith.addf %391, %392 : vector<8x64xf32>
    %394 = math.tanh %393 : vector<8x64xf32>
    %395 = arith.mulf %390, %394 : vector<8x64xf32>
    %396 = arith.truncf %395 : vector<8x64xf32> to vector<8x64xbf16>
    %397 = vector.extract_strided_slice %395 {offsets = [0, 0], sizes = [8, 32], strides = [1, 1]} : vector<8x64xf32> to vector<8x32xf32>
    %c40_96 = arith.constant 40 : index
    %c0_97 = arith.constant 0 : index
    %398 = vector.load %arg10[%c40_96, %c0_97] : memref<64x64xf32, #tpu.memory_space<vmem>>, vector<8x32xf32>
    tpu.vector_store %arg10[%c40_96, %c0_97], %397 {strides = array<i32>} : memref<64x64xf32, #tpu.memory_space<vmem>>, vector<8x32xf32>,
    %399 = vector.extract_strided_slice %395 {offsets = [0, 32], sizes = [8, 32], strides = [1, 1]} : vector<8x64xf32> to vector<8x32xf32>
    %c16_98 = arith.constant 16 : index
    %c32_99 = arith.constant 32 : index
    %400 = vector.load %arg10[%c16_98, %c32_99] : memref<64x64xf32, #tpu.memory_space<vmem>>, vector<8x32xf32>
    tpu.vector_store %arg10[%c16_98, %c32_99], %399 {strides = array<i32>} : memref<64x64xf32, #tpu.memory_space<vmem>>, vector<8x32xf32>,
    %401 = vector.extract_strided_slice %241 {offsets = [48, 0], sizes = [8, 256], strides = [1, 1]} : vector<64x256xf32> to vector<8x256xf32>
    %402 = vector.extract_strided_slice %241 {offsets = [8, 0], sizes = [8, 256], strides = [1, 1]} : vector<64x256xf32> to vector<8x256xf32>
    %403 = arith.select %18, %401, %402 : vector<8x256xi1>, vector<8x256xf32>
    %cst_100 = arith.constant dense<0.000000e+00> : vector<8x256xf32>
    %404 = tpu.matmul %396, %242, %cst_100 {dimension_numbers = #tpu.dot_dimension_numbers<[1], [0], [0], [1], [0, 0, 1, 1], [], []>} : vector<8x64xbf16>, vector<64x256xbf16>, vector<8x256xf32> -> vector<8x256xf32>
    %405 = arith.addf %403, %404 : vector<8x256xf32>
    %406 = vector.extract_strided_slice %405 {offsets = [0, 0], sizes = [8, 192], strides = [1, 1]} : vector<8x256xf32> to vector<8x192xf32>
    %407 = arith.negf %406 : vector<8x192xf32>
    %408 = math.exp %407 : vector<8x192xf32>
    %cst_101 = arith.constant 1.000000e+00 : f32
    %409 = vector.broadcast %cst_101 : f32 to vector<8x192xf32>
    %410 = arith.addf %409, %408 : vector<8x192xf32>
    %411 = arith.divf %409, %410 : vector<8x192xf32>
    %412 = vector.extract_strided_slice %405 {offsets = [0, 192], sizes = [8, 64], strides = [1, 1]} : vector<8x256xf32> to vector<8x64xf32>
    %413 = math.tanh %412 : vector<8x64xf32>
    %414 = vector.extract_strided_slice %411 {offsets = [0, 0], sizes = [8, 64], strides = [1, 1]} : vector<8x192xf32> to vector<8x64xf32>
    %415 = vector.extract_strided_slice %411 {offsets = [0, 64], sizes = [8, 64], strides = [1, 1]} : vector<8x192xf32> to vector<8x64xf32>
    %416 = vector.extract_strided_slice %411 {offsets = [0, 128], sizes = [8, 64], strides = [1, 1]} : vector<8x192xf32> to vector<8x64xf32>
    %417 = arith.mulf %415, %393 : vector<8x64xf32>
    %418 = arith.mulf %414, %413 : vector<8x64xf32>
    %419 = arith.addf %417, %418 : vector<8x64xf32>
    %420 = math.tanh %419 : vector<8x64xf32>
    %421 = arith.mulf %416, %420 : vector<8x64xf32>
    %422 = arith.truncf %421 : vector<8x64xf32> to vector<8x64xbf16>
    %423 = vector.extract_strided_slice %421 {offsets = [0, 0], sizes = [8, 32], strides = [1, 1]} : vector<8x64xf32> to vector<8x32xf32>
    %c48_102 = arith.constant 48 : index
    %c0_103 = arith.constant 0 : index
    %424 = vector.load %arg10[%c48_102, %c0_103] : memref<64x64xf32, #tpu.memory_space<vmem>>, vector<8x32xf32>
    tpu.vector_store %arg10[%c48_102, %c0_103], %423 {strides = array<i32>} : memref<64x64xf32, #tpu.memory_space<vmem>>, vector<8x32xf32>,
    %425 = vector.extract_strided_slice %421 {offsets = [0, 32], sizes = [8, 32], strides = [1, 1]} : vector<8x64xf32> to vector<8x32xf32>
    %c8_104 = arith.constant 8 : index
    %c32_105 = arith.constant 32 : index
    %426 = vector.load %arg10[%c8_104, %c32_105] : memref<64x64xf32, #tpu.memory_space<vmem>>, vector<8x32xf32>
    tpu.vector_store %arg10[%c8_104, %c32_105], %425 {strides = array<i32>} : memref<64x64xf32, #tpu.memory_space<vmem>>, vector<8x32xf32>,
    %427 = vector.extract_strided_slice %241 {offsets = [56, 0], sizes = [8, 256], strides = [1, 1]} : vector<64x256xf32> to vector<8x256xf32>
    %428 = vector.extract_strided_slice %241 {offsets = [0, 0], sizes = [8, 256], strides = [1, 1]} : vector<64x256xf32> to vector<8x256xf32>
    %429 = arith.select %18, %427, %428 : vector<8x256xi1>, vector<8x256xf32>
    %cst_106 = arith.constant dense<0.000000e+00> : vector<8x256xf32>
    %430 = tpu.matmul %422, %242, %cst_106 {dimension_numbers = #tpu.dot_dimension_numbers<[1], [0], [0], [1], [0, 0, 1, 1], [], []>} : vector<8x64xbf16>, vector<64x256xbf16>, vector<8x256xf32> -> vector<8x256xf32>
    %431 = arith.addf %429, %430 : vector<8x256xf32>
    %432 = vector.extract_strided_slice %431 {offsets = [0, 0], sizes = [8, 192], strides = [1, 1]} : vector<8x256xf32> to vector<8x192xf32>
    %433 = arith.negf %432 : vector<8x192xf32>
    %434 = math.exp %433 : vector<8x192xf32>
    %cst_107 = arith.constant 1.000000e+00 : f32
    %435 = vector.broadcast %cst_107 : f32 to vector<8x192xf32>
    %436 = arith.addf %435, %434 : vector<8x192xf32>
    %437 = arith.divf %435, %436 : vector<8x192xf32>
    %438 = vector.extract_strided_slice %431 {offsets = [0, 192], sizes = [8, 64], strides = [1, 1]} : vector<8x256xf32> to vector<8x64xf32>
    %439 = math.tanh %438 : vector<8x64xf32>
    %440 = vector.extract_strided_slice %437 {offsets = [0, 0], sizes = [8, 64], strides = [1, 1]} : vector<8x192xf32> to vector<8x64xf32>
    %441 = vector.extract_strided_slice %437 {offsets = [0, 64], sizes = [8, 64], strides = [1, 1]} : vector<8x192xf32> to vector<8x64xf32>
    %442 = vector.extract_strided_slice %437 {offsets = [0, 128], sizes = [8, 64], strides = [1, 1]} : vector<8x192xf32> to vector<8x64xf32>
    %443 = arith.mulf %441, %419 : vector<8x64xf32>
    %444 = arith.mulf %440, %439 : vector<8x64xf32>
    %445 = arith.addf %443, %444 : vector<8x64xf32>
    %446 = math.tanh %445 : vector<8x64xf32>
    %447 = arith.mulf %442, %446 : vector<8x64xf32>
    %448 = vector.extract_strided_slice %447 {offsets = [0, 0], sizes = [8, 32], strides = [1, 1]} : vector<8x64xf32> to vector<8x32xf32>
    %c56_108 = arith.constant 56 : index
    %c0_109 = arith.constant 0 : index
    %449 = vector.load %arg10[%c56_108, %c0_109] : memref<64x64xf32, #tpu.memory_space<vmem>>, vector<8x32xf32>
    tpu.vector_store %arg10[%c56_108, %c0_109], %448 {strides = array<i32>} : memref<64x64xf32, #tpu.memory_space<vmem>>, vector<8x32xf32>,
    %450 = vector.extract_strided_slice %447 {offsets = [0, 32], sizes = [8, 32], strides = [1, 1]} : vector<8x64xf32> to vector<8x32xf32>
    %c0_110 = arith.constant 0 : index
    %c32_111 = arith.constant 32 : index
    %451 = vector.load %arg10[%c0_110, %c32_111] : memref<64x64xf32, #tpu.memory_space<vmem>>, vector<8x32xf32>
    tpu.vector_store %arg10[%c0_110, %c32_111], %450 {strides = array<i32>} : memref<64x64xf32, #tpu.memory_space<vmem>>, vector<8x32xf32>,
    %c0_112 = arith.constant 0 : index
    %c0_113 = arith.constant 0 : index
    %452 = vector.load %arg10[%c0_112, %c0_113] : memref<64x64xf32, #tpu.memory_space<vmem>>, vector<64x64xf32>
    %c0_114 = arith.constant 0 : index
    %c0_115 = arith.constant 0 : index
    %453 = vector.load %arg7[%c0_114, %c0_115] : memref<1x64xf32, #tpu.memory_space<vmem>>, vector<1x64xf32>
    %454 = vector.broadcast %453 : vector<1x64xf32> to vector<64x64xf32>
    %455 = arith.mulf %452, %454 : vector<64x64xf32>
    %cst_116 = arith.constant dense<0.000000e+00> : vector<64xf32>
    %456 = vector.multi_reduction <add>, %455, %cst_116 [1] : vector<64x64xf32> to vector<64xf32>
    %457 = vector.shape_cast %456 : vector<64xf32> to vector<64x1xf32>
    %c0_117 = arith.constant 0 : index
    %c0_118 = arith.constant 0 : index
    %458 = vector.load %arg8[%c0_117, %c0_118] : memref<1x1xf32, #tpu.memory_space<vmem>>, vector<1x1xf32>
    %459 = vector.broadcast %458 : vector<1x1xf32> to vector<64x1xf32>
    %460 = arith.addf %457, %459 : vector<64x1xf32>
    %461 = arith.negf %460 : vector<64x1xf32>
    %462 = math.exp %461 : vector<64x1xf32>
    %cst_119 = arith.constant 1.000000e+00 : f32
    %463 = vector.broadcast %cst_119 : f32 to vector<64x1xf32>
    %464 = arith.addf %463, %462 : vector<64x1xf32>
    %465 = arith.divf %463, %464 : vector<64x1xf32>
    %466 = vector.shape_cast %465 : vector<64x1xf32> to vector<64x1xf32>
    %467 = vector.broadcast %466 : vector<64x1xf32> to vector<64x128xf32>
    %c0_120 = arith.constant 0 : index
    %c0_121 = arith.constant 0 : index
    %468 = vector.load %arg9[%c0_120, %c0_121] : memref<64x128xf32, #tpu.memory_space<vmem>>, vector<64x128xf32>
    tpu.vector_store %arg9[%c0_120, %c0_121], %467 {strides = array<i32>} : memref<64x128xf32, #tpu.memory_space<vmem>>, vector<64x128xf32>,
    return
  }
}

</mosaic_0001>

<bundles_post_ra>
// kernel: squeeze.1
= control target key start
LH: loop header
LB: loop body
LE: loop exit
PB: predicated region body
PF: predicated region fallthrough
CT: control target
= control target key end

     0   :  { %s66_s8 = smov 104   ;;  %vm7_vm0 = vcmask 64512   ;;  %s67_s11 = smov 112   ;;  %s117_s0 = inlined_call_operand.vmem [shape: f32[64], index: 0, kind: input, shape index: {}]   ;;  %s118_s1 = inlined_call_operand.vmem [shape: f32[8,8], index: 1, kind: output, shape index: {}]  }
   0x1   :  { %v4_v0 = vld [vmem:[%s117_s0] sm:$0x1]  ;;  %s65_s0 = smov 120   ;;  %s68_s12 = smov 96  }
   0x2   :  { %5 = vst [vmem:[#allocation0] sm:$0x1] %v4_v0  ;;  %s69_s13 = smov 88   ;;  %s70_s14 = smov 80  }
   0x3   :  { %s71_s15 = smov 72  }
   0x9   :  { %v9_v1 = vld [vmem:[#allocation0] sm:$0x1]  }
   0xa   :  { %v21_v2 = vld [vmem:[#allocation0] sm:$0x1]   ;;  %10 = vrot.lane.b32.xlu0 %v9_v1, %s65_s0 }
   0xb   :  { %22 = vrot.lane.b32.xlu1 %v21_v2, %s66_s8  ;;  %v15_v3 = vld [vmem:[#allocation0] sm:$0x1]  }
   0xc   :  { %v27_v4 = vld [vmem:[#allocation0] sm:$0x1]  }
   0xd   :  { %v6_v5 = vld [vmem:[#allocation0] sm:$0x1]  }
   0xe   :  { %8 = vst.msk [vmem:[%s118_s1] sm:$0x1] %vm7_vm0, %v6_v5   ;;  %16 = vrot.lane.b32.xlu0 %v15_v3, %s67_s11  ;;  %v33_v6 = vld [vmem:[#allocation0] sm:$0x1]  }
   0xf   :  { %28 = vrot.lane.b32.xlu1 %v27_v4, %s68_s12  ;;  %v39_v7 = vld [vmem:[#allocation0] sm:$0x1]  }
  0x10   :  { %v45_v8 = vld [vmem:[#allocation0] sm:$0x1]  }
  0x12   :  { %34 = vrot.lane.b32.xlu0 %v33_v6, %s69_s13 }
  0x13   :  { %40 = vrot.lane.b32.xlu1 %v39_v7, %s70_s14 }
  0x16   :  { %46 = vrot.lane.b32.xlu0 %v45_v8, %s71_s15 }
  0x7c   :  { %v11_v9 = vpop.permute.xlu0 %10  }
  0x7d   :  { %v23_v10 = vpop.permute.xlu1 %22   ;;  %51 = vst.msk [vmem:[%s118_s1 + $0x1] sm:$0x1] %vm7_vm0, %v11_v9  }
  0x7e   :  { %53 = vst.msk [vmem:[%s118_s1 + $0x3] sm:$0x1] %vm7_vm0, %v23_v10  }
  0x80   :  { %v17_v11 = vpop.permute.xlu0 %16  }
  0x81   :  { %v29_v12 = vpop.permute.xlu1 %28   ;;  %52 = vst.msk [vmem:[%s118_s1 + $0x2] sm:$0x1] %vm7_vm0, %v17_v11  }
  0x82   :  { %54 = vst.msk [vmem:[%s118_s1 + $0x4] sm:$0x1] %vm7_vm0, %v29_v12  }
  0x84   :  { %v35_v13 = vpop.permute.xlu0 %34  }
  0x85   :  { %v41_v14 = vpop.permute.xlu1 %40   ;;  %55 = vst.msk [vmem:[%s118_s1 + $0x5] sm:$0x1] %vm7_vm0, %v35_v13  }
  0x86   :  { %56 = vst.msk [vmem:[%s118_s1 + $0x6] sm:$0x1] %vm7_vm0, %v41_v14  }
  0x88   :  { %v47_v15 = vpop.permute.xlu0 %46  }
  0x89   :  { %57 = vst.msk [vmem:[%s118_s1 + $0x7] sm:$0x1] %vm7_vm0, %v47_v15  }

// kernel: bilstm_forward.1
= control target key start
LH: loop header
LB: loop body
LE: loop exit
PB: predicated region body
PF: predicated region fallthrough
CT: control target
= control target key end

     0   :  { %v2276_v1 = vmov 0   ;;  %vm116_vm0 = vcmask 130048   ;;  %v35_v15 = vlaneseq  ;;  %vm330_vm3 = vcmask 261120   ;;  %s3112_s1 = inlined_call_operand.vmem [shape: bf16[16,256], index: 1, kind: input, shape index: {}]   ;;  %s3113_s0 = inlined_call_operand.vmem [shape: bf16[64,16], index: 0, kind: input, shape index: {}]   ;;  %s3114_s2 = inlined_call_operand.vmem [shape: bf16[64,256], index: 2, kind: input, shape index: {}]   ;;  %s3115_s3 = inlined_call_operand.vmem [shape: f32[1,256], index: 3, kind: input, shape index: {}]   ;;  %s3116_s4 = inlined_call_operand.vmem [shape: bf16[64,256], index: 4, kind: input, shape index: {}]   ;;  %s3117_s5 = inlined_call_operand.vmem [shape: bf16[64,256], index: 5, kind: input, shape index: {}]   ;;  %s3118_s6 = inlined_call_operand.vmem [shape: f32[1,256], index: 6, kind: input, shape index: {}]   ;;  %s3119_s7 = inlined_call_operand.vmem [shape: f32[1,64], index: 7, kind: input, shape index: {}]   ;;  %s3120_s8 = inlined_call_operand.<no memory space> [shape: f32[1,1], index: 8, kind: input, shape index: {}]   ;;  %s3121_s9 = inlined_call_operand.vmem [shape: f32[64,128], index: 9, kind: output, shape index: {}]  }
   0x1   :  { %v2009_v0 = vld [vmem:[%s3112_s1 + $0x4] ss:$8 sps:$4 sm:$0xff]   ;;  %161 = vmatprep.mubr.bf16.mxu0 %v2276_v1  ;;  %288 = vmatprep.mubr.bf16.mxu1 %v2276_v1  ;;  %v2011_v2 = vld [vmem:[%s3112_s1] ss:$8 sps:$4 sm:$0xff]   ;;  %v2354_v6 = vld [vmem:[%s3114_s2 + $0x14] ss:$8 sps:$4 sm:$0xff]  }
   0x2   :  { %2008 = vset.pattern.permute.xlu1 %v2276_v1  ;;  %2007 = vset.pattern.permute.xlu0 %v2276_v1  ;;  %v2012_v3 = vld [vmem:[%s3113_s0] sm:$0xff]   ;;  %v2363_v7 = vld [vmem:[%s3114_s2 + $0x10] ss:$8 sps:$4 sm:$0xff]   ;;  %v2013_v9 = vld [vmem:[%s3113_s0 + $0x8] sm:$0xff]   ;;  %v2426_v16 = vshrl.u32 %v35_v15, 7  ;;  %v36_v28 = vand.u32 127, %v35_v15 }
   0x3   :  { %129 = vmatprep.subr.bf16.mxu0 %v2009_v0  ;;  %v2344_v4 = vld [vmem:[%s3114_s2 + $0x4] ss:$8 sps:$4 sm:$0xff]   ;;  %v2349_v5 = vld [vmem:[%s3114_s2] ss:$8 sps:$4 sm:$0xff]   ;;  %v2387_v11 = vld [vmem:[%s3114_s2 + $0x34] ss:$8 sps:$4 sm:$0xff]  }
   0x4   :  { %130 = vmatpush1.bf16.msra.mxu0 %v2011_v2  ;;  %256 = vmatprep.subr.bf16.mxu1 %v2344_v4  ;;  %v2369_v8 = vld [vmem:[%s3114_s2 + $0x24] ss:$8 sps:$4 sm:$0xff]   ;;  %v2381_v10 = vld [vmem:[%s3114_s2 + $0x20] ss:$8 sps:$4 sm:$0xff]   ;;  %v2397_v12 = vld [vmem:[%s3114_s2 + $0x30] ss:$8 sps:$4 sm:$0xff]  }
   0x5   :  { %257 = vmatpush1.bf16.msra.mxu1 %v2349_v5  ;;  %420 = vmatprep.subr.bf16.mxu0 %v2344_v4  ;;  %v2020_v13 = vld [vmem:[%s3113_s0 + $0x10] sm:$0xff]   ;;  %v2027_v14 = vld [vmem:[%s3113_s0 + $0x18] sm:$0xff]   ;;  %v78_v17 = vsub.s32 0, %v2426_v16  ;;  %v74_v18 = vld [vmem:[%s3115_s3] sm:$0x3]  ;;  %v82_v19 = vsub.s32 1, %v2426_v16 }
   0x6   :  { %258 = vmatprep.subr.bf16.mxu1 %v2354_v6  ;;  %v37_v30 = vadd.s32 128, %v36_v28  ;;  %v42_v37 = vand.u32 63, %v36_v28  ;;  %s2277_s3 = smov 64   ;;  %vm332_vm4 = vcmask 523520   ;;  %vm252_vm5 = vcmask 523264  }
   0x7   :  { %1917 = vmatmul.mubr.msk.bf16.vlgmr.msra.gmra.mrb[0].mxu0 %vm116_vm0, %v2012_v3  ;;  %v79_v21 = vrot.slane %v74_v18, %v78_v17  ;;  %v83_v23 = vrot.slane %v74_v18, %v82_v19 }
   0x8   :  { %171 = vmatprep.mubr.bf16.mxu0 %v2276_v1  ;;  %421 = vmatpush1.bf16.msra.mxu0 %v2349_v5  ;;  %v49_v39 = vand.u32 63, %v37_v30  ;;  %vm2449_vm1 = vcmp.lt.s32.totalorder %v42_v37, 32 }
   0x9   :  { %422 = vmatprep.subr.bf16.mxu0 %v2354_v6  ;;  %259 = vmatpush1.bf16.msra.mxu1 %v2363_v7 }
   0xa   :  { %260 = vmatprep.subr.bf16.mxu1 %v2369_v8  ;;  %vm2453_vm2 = vcmp.lt.s32.totalorder %v49_v39, 32 }
   0xc   :  { %423 = vmatpush1.bf16.msra.mxu0 %v2363_v7 }
   0xd   :  { %424 = vmatprep.subr.bf16.mxu0 %v2369_v8  ;;  %261 = vmatpush1.bf16.msra.mxu1 %v2381_v10 }
   0xe   :  { %262 = vmatprep.subr.bf16.mxu1 %v2387_v11 }
   0xf   :  { %1918 = vmatmul.mubr.msk.bf16.gmra.mrb[4].mxu0 %vm116_vm0, %v2013_v9 }
  0x10   :  { %181 = vmatprep.mubr.bf16.mxu0 %v2276_v1  ;;  %425 = vmatpush1.bf16.msra.mxu0 %v2381_v10 }
  0x11   :  { %426 = vmatprep.subr.bf16.mxu0 %v2387_v11  ;;  %263 = vmatpush1.bf16.msra.mxu1 %v2397_v12 }
  0x12   :  { %339 = vmatprep.subr.bf16.mxu1 %v2344_v4 }
  0x14   :  { %427 = vmatpush1.bf16.msra.mxu0 %v2397_v12  ;;  %289 = vmatmul.mubr.bf16.vlgmr.msra.gmra.mrb[0].mxu1 %v2276_v1 }
  0x15   :  { %340 = vmatpush1.bf16.msra.mxu1 %v2349_v5  ;;  %371 = vmatprep.mubr.bf16.mxu1 %v2276_v1 }
  0x16   :  { %341 = vmatprep.subr.bf16.mxu1 %v2354_v6  ;;  %582 = vmatprep.subr.bf16.mxu0 %v2344_v4 }
  0x17   :  { %1919 = vmatmul.mubr.msk.bf16.gmra.mrb[8].mxu0 %vm116_vm0, %v2020_v13 }
  0x18   :  { %191 = vmatprep.mubr.bf16.mxu0 %v2276_v1 }
  0x19   :  { %342 = vmatpush1.bf16.msra.mxu1 %v2363_v7 }
  0x1a   :  { %343 = vmatprep.subr.bf16.mxu1 %v2369_v8 }
  0x1d   :  { %344 = vmatpush1.bf16.msra.mxu1 %v2381_v10 }
  0x1e   :  { %345 = vmatprep.subr.bf16.mxu1 %v2387_v11 }
  0x1f   :  { %1920 = vmatmul.mubr.msk.bf16.gmra.mrb[12].mxu0 %vm116_vm0, %v2027_v14 }
  0x20   :  { %452 = vmatprep.mubr.bf16.mxu0 %v2276_v1 }
  0x21   :  { %346 = vmatpush1.bf16.msra.mxu1 %v2397_v12 }
  0x22   :  { %501 = vmatprep.subr.bf16.mxu1 %v2344_v4 }
  0xda   :  { %v163_v20 = vpop.f32.mrb[0].mxu0 }
  0xdb   :  { %v165_v22 = vpop.f32.mrb[1].mxu0  ;;  %v2501_v9 = vadd.f32 %v163_v20, %v79_v21 }
  0xdc   :  { %v167_v24 = vpop.f32.mrb[2].mxu0 }
  0xdd   :  { %v2437_v25 = vadd.f32 %v167_v24, %v79_v21  ;;  %v169_v26 = vpop.f32.mrb[3].mxu0  ;;  %v2513_v24 = vadd.f32 %v165_v22, %v83_v23 }
  0xde   :  { %v2439_v27 = vadd.f32 %v169_v26, %v83_v23 }
  0xe2   :  { %v173_v29 = vpop.f32.mrb[4].mxu0 }
  0xe3   :  { %v2441_v31 = vadd.f32 %v173_v29, %v79_v21  ;;  %v175_v32 = vpop.f32.mrb[5].mxu0 }
  0xe4   :  { %v2443_v33 = vadd.f32 %v175_v32, %v83_v23  ;;  %v177_v34 = vpop.f32.mrb[6].mxu0 }
  0xe5   :  { %v2445_v35 = vadd.f32 %v177_v34, %v79_v21  ;;  %v179_v36 = vpop.f32.mrb[7].mxu0 }
  0xe6   :  { %v2447_v38 = vadd.f32 %v179_v36, %v83_v23 }
  0xe7   :  { %v290_v42 = vpop.f32.mrb[0].mxu1 }
  0xe8   :  { %v292_v46 = vpop.f32.mrb[1].mxu1 }
  0xe9   :  { %v294_v49 = vpop.f32.mrb[2].mxu1 }
  0xea   :  { %v183_v41 = vpop.f32.mrb[8].mxu0  ;;  %v295_v52 = vpop.f32.mrb[3].mxu1 }
  0xeb   :  { %v2457_v44 = vadd.f32 %v183_v41, %v79_v21  ;;  %v185_v45 = vpop.f32.mrb[9].mxu0 }
  0xec   :  { %v2459_v47 = vadd.f32 %v185_v45, %v83_v23  ;;  %v187_v48 = vpop.f32.mrb[10].mxu0 }
  0xed   :  { %v2461_v50 = vadd.f32 %v187_v48, %v79_v21  ;;  %v189_v51 = vpop.f32.mrb[11].mxu0  ;;  %v496_v53 = vsel %vm2449_vm1, %v2445_v35, %v2457_v44  ;;  %v577_v54 = vsel %vm2449_vm1, %v2457_v44, %v2445_v35 }
  0xee   :  { %v2471_v55 = vadd.f32 %v189_v51, %v83_v23  ;;  %v497_v56 = vsel %vm2453_vm2, %v2447_v38, %v2459_v47  ;;  %v578_v57 = vsel %vm2453_vm2, %v2459_v47, %v2447_v38 }
  0xef   :  { %v415_v58 = vsel %vm2449_vm1, %v2441_v31, %v2461_v50  ;;  %v658_v59 = vsel %vm2449_vm1, %v2461_v50, %v2441_v31 }
  0xf0   :  { %v416_v60 = vsel %vm2453_vm2, %v2443_v33, %v2471_v55  ;;  %v659_v61 = vsel %vm2453_vm2, %v2471_v55, %v2443_v33 }
  0xf2   :  { %v193_v62 = vpop.f32.mrb[12].mxu0 }
  0xf3   :  { %v2497_v63 = vadd.f32 %v193_v62, %v79_v21  ;;  %v195_v0 = vpop.f32.mrb[13].mxu0 }
  0xf4   :  { %v2499_v2 = vadd.f32 %v195_v0, %v83_v23  ;;  %v197_v3 = vpop.f32.mrb[14].mxu0 }
  0xf5   :  { %v2503_v13 = vadd.f32 %v197_v3, %v79_v21  ;;  %v199_v14 = vpop.f32.mrb[15].mxu0  ;;  %v334_v15 = vsel %vm2449_vm1, %v2437_v25, %v2497_v63  ;;  %v739_v18 = vsel %vm2449_vm1, %v2497_v63, %v2437_v25 }
  0xf6   :  { %v2515_v26 = vadd.f32 %v199_v14, %v83_v23  ;;  %v335_v20 = vsel %vm2453_vm2, %v2439_v27, %v2499_v2  ;;  %v740_v21 = vsel %vm2453_vm2, %v2499_v2, %v2439_v27 }
  0xf7   :  { %v210_v28 = vsel %vm2449_vm1, %v2501_v9, %v2503_v13  ;;  %v820_v22 = vsel %vm2449_vm1, %v2503_v13, %v2501_v9 }
  0xf8   :  { %v297_v23 = vadd.f32 %v290_v42, %v210_v28  ;;  %v211_v29 = vsel %vm2453_vm2, %v2513_v24, %v2515_v26  ;;  %v821_v30 = vsel %vm2453_vm2, %v2515_v26, %v2513_v24  ;;  %v2028_v24 = vld [vmem:[%s3116_s4] ss:$8 sps:$4 sm:$0xff]   ;;  %v2030_v26 = vld [vmem:[%s3116_s4 + $0x4] ss:$8 sps:$4 sm:$0xff]  }
  0xf9   :  { %v298_v32 = vadd.f32 %v292_v46, %v211_v29 }
  0xfa   :  { %v1929_v36 = vmul.f32 -1.442695, %v297_v23 }
  0xfb   :  { %2052 = vtanh.f32 %v298_v32  ;;  %v1930_v52 = vmul.f32 -1.442695, %v298_v32 }
  0xfc   :  { %2054 = vpow2.f32 %v1929_v36 }
 0x105   :  { %v2053_v34 = vpop.eup %2052 }
 0x106   :  { %314 = vrot.lane.b32.xlu0 %v2053_v34, %s2277_s3  ;;  %v2055_v37 = vpop.eup %2054 }
 0x107   :  { %v305_v39 = vadd.f32 1.0, %v2055_v37 }
 0x109   :  { %2056 = vrcp.f32 %v305_v39 }
 0x113   :  { %v2057_v41 = vpop.eup %2056 }
 0x114   :  { %v312_v48 = vmul.f32 0.0, %v2057_v41 }
 0x178   :  { %v315_v42 = vpop.permute.xlu0 %314 }
 0x179   :  { %v317_v45 = vmul.f32 %v2057_v41, %v315_v42 }
 0x17b   :  { %319 = vrot.lane.b32.xlu0 %v317_v45, %s2277_s3 }
 0x1ed   :  { %v320_v49 = vpop.permute.xlu0 %319 }
 0x1ee   :  { %v322_v51 = vadd.f32 %v320_v49, %v312_v48 }
 0x1f0   :  { %2058 = vtanh.f32 %v322_v51 }
 0x1f1   :  { %2060 = vpow2.f32 %v1930_v52 }
 0x1fa   :  { %v2059_v46 = vpop.eup %2058 }
 0x1fb   :  { %325 = vrot.lane.b32.xlu1 %v2059_v46, %s2277_s3  ;;  %v2061_v62 = vpop.eup %2060 }
 0x1fc   :  { %v306_v0 = vadd.f32 1.0, %v2061_v62 }
 0x1fe   :  { %2062 = vrcp.f32 %v306_v0 }
 0x208   :  { %v2063_v3 = vpop.eup %2062 }
 0x26d   :  { %v326_v14 = vpop.permute.xlu1 %325 }
 0x26e   :  { %v328_v28 = vmul.f32 %v2063_v3, %v326_v14 }
 0x270   :  { %v329_v23 = vpack.c.bf16 %v328_v28, %v328_v28  ;;  %331 = vst.msk [vmem:[#allocation2] sm:$0xff] %vm330_vm3, %v328_v28 }
 0x271   :  { %333 = vst.msk [vmem:[#allocation2 + $0x38] sm:$0xff] %vm332_vm4, %v328_v28 }
 0x272   :  { %1931 = vmatmul.mubr.msk.bf16.vlgmr.msra.gmra.mrb[4].mxu1 %vm252_vm5, %v329_v23 }
 0x273   :  { %502 = vmatpush1.bf16.msra.mxu1 %v2349_v5  ;;  %533 = vmatprep.mubr.bf16.mxu1 %v2276_v1 }
 0x274   :  { %503 = vmatprep.subr.bf16.mxu1 %v2354_v6 }
 0x277   :  { %504 = vmatpush1.bf16.msra.mxu1 %v2363_v7 }
 0x278   :  { %505 = vmatprep.subr.bf16.mxu1 %v2369_v8 }
 0x27b   :  { %506 = vmatpush1.bf16.msra.mxu1 %v2381_v10 }
 0x27c   :  { %507 = vmatprep.subr.bf16.mxu1 %v2387_v11 }
 0x27f   :  { %508 = vmatpush1.bf16.msra.mxu1 %v2397_v12 }
 0x280   :  { %663 = vmatprep.subr.bf16.mxu1 %v2344_v4 }
 0x345   :  { %v373_v29 = vpop.f32.mrb[4].mxu1 }
 0x346   :  { %v380_v32 = vadd.f32 %v373_v29, %v334_v15  ;;  %v375_v34 = vpop.f32.mrb[5].mxu1 }
 0x347   :  { %v381_v36 = vadd.f32 %v375_v34, %v335_v20  ;;  %v377_v37 = vpop.f32.mrb[6].mxu1 }
 0x348   :  { %v378_v39 = vpop.f32.mrb[7].mxu1  ;;  %v1932_v42 = vmul.f32 -1.442695, %v380_v32 }
 0x349   :  { %2064 = vtanh.f32 %v381_v36  ;;  %v1933_v3 = vmul.f32 -1.442695, %v381_v36 }
 0x34a   :  { %2066 = vpow2.f32 %v1932_v42 }
 0x353   :  { %v2065_v41 = vpop.eup %2064 }
 0x354   :  { %397 = vrot.lane.b32.xlu1 %v2065_v41, %s2277_s3  ;;  %v2067_v45 = vpop.eup %2066 }
 0x355   :  { %v388_v48 = vadd.f32 1.0, %v2067_v45 }
 0x357   :  { %2068 = vrcp.f32 %v388_v48 }
 0x361   :  { %v2069_v49 = vpop.eup %2068 }
 0x362   :  { %v395_v62 = vmul.f32 %v2069_v49, %v322_v51 }
 0x3c6   :  { %v398_v46 = vpop.permute.xlu1 %397 }
 0x3c7   :  { %v400_v52 = vmul.f32 %v2069_v49, %v398_v46 }
 0x3c9   :  { %402 = vrot.lane.b32.xlu0 %v400_v52, %s2277_s3 }
 0x43b   :  { %v403_v15 = vpop.permute.xlu0 %402 }
 0x43c   :  { %v405_v0 = vadd.f32 %v403_v15, %v395_v62 }
 0x43e   :  { %2070 = vtanh.f32 %v405_v0 }
 0x43f   :  { %2072 = vpow2.f32 %v1933_v3 }
 0x448   :  { %v2071_v20 = vpop.eup %2070 }
 0x449   :  { %408 = vrot.lane.b32.xlu1 %v2071_v20, %s2277_s3  ;;  %v2073_v14 = vpop.eup %2072 }
 0x44a   :  { %v389_v28 = vadd.f32 1.0, %v2073_v14 }
 0x44c   :  { %2074 = vrcp.f32 %v389_v28 }
 0x456   :  { %v2075_v23 = vpop.eup %2074 }
 0x4bb   :  { %v409_v29 = vpop.permute.xlu1 %408 }
 0x4bc   :  { %v411_v32 = vmul.f32 %v2075_v23, %v409_v29 }
 0x4be   :  { %v412_v34 = vpack.c.bf16 %v411_v32, %v411_v32  ;;  %413 = vst.msk [vmem:[#allocation2 + $0x8] sm:$0xff] %vm330_vm3, %v411_v32 }
 0x4bf   :  { %414 = vst.msk [vmem:[#allocation2 + $0x30] sm:$0xff] %vm332_vm4, %v411_v32 }
 0x4c0   :  { %1934 = vmatmul.mubr.msk.bf16.vlgmr.msra.gmra.mrb[16].mxu0 %vm252_vm5, %v412_v34 }
 0x4c1   :  { %583 = vmatpush1.bf16.msra.mxu0 %v2349_v5  ;;  %614 = vmatprep.mubr.bf16.mxu0 %v2276_v1 }
 0x4c2   :  { %584 = vmatprep.subr.bf16.mxu0 %v2354_v6 }
 0x4c5   :  { %585 = vmatpush1.bf16.msra.mxu0 %v2363_v7 }
 0x4c6   :  { %586 = vmatprep.subr.bf16.mxu0 %v2369_v8 }
 0x4c9   :  { %587 = vmatpush1.bf16.msra.mxu0 %v2381_v10 }
 0x4ca   :  { %588 = vmatprep.subr.bf16.mxu0 %v2387_v11 }
 0x4cd   :  { %589 = vmatpush1.bf16.msra.mxu0 %v2397_v12 }
 0x4ce   :  { %744 = vmatprep.subr.bf16.mxu0 %v2344_v4 }
 0x593   :  { %v454_v51 = vpop.f32.mrb[16].mxu0 }
 0x594   :  { %v461_v36 = vadd.f32 %v454_v51, %v415_v58  ;;  %v456_v37 = vpop.f32.mrb[17].mxu0 }
 0x595   :  { %v462_v39 = vadd.f32 %v456_v37, %v416_v60  ;;  %v458_v41 = vpop.f32.mrb[18].mxu0 }
 0x596   :  { %v459_v42 = vpop.f32.mrb[19].mxu0  ;;  %v1935_v48 = vmul.f32 -1.442695, %v461_v36 }
 0x597   :  { %2076 = vtanh.f32 %v462_v39  ;;  %v1936_v14 = vmul.f32 -1.442695, %v462_v39 }
 0x598   :  { %2078 = vpow2.f32 %v1935_v48 }
 0x5a1   :  { %v2077_v45 = vpop.eup %2076 }
 0x5a2   :  { %478 = vrot.lane.b32.xlu0 %v2077_v45, %s2277_s3  ;;  %v2079_v49 = vpop.eup %2078 }
 0x5a3   :  { %v469_v46 = vadd.f32 1.0, %v2079_v49 }
 0x5a5   :  { %2080 = vrcp.f32 %v469_v46 }
 0x5af   :  { %v2081_v52 = vpop.eup %2080 }
 0x5b0   :  { %v476_v15 = vmul.f32 %v2081_v52, %v405_v0 }
 0x614   :  { %v479_v58 = vpop.permute.xlu0 %478 }
 0x615   :  { %v481_v62 = vmul.f32 %v2081_v52, %v479_v58 }
 0x617   :  { %483 = vrot.lane.b32.xlu1 %v481_v62, %s2277_s3 }
 0x689   :  { %v484_v20 = vpop.permute.xlu1 %483 }
 0x68a   :  { %v486_v3 = vadd.f32 %v484_v20, %v476_v15 }
 0x68c   :  { %2082 = vtanh.f32 %v486_v3 }
 0x68d   :  { %2084 = vpow2.f32 %v1936_v14 }
 0x696   :  { %v2083_v60 = vpop.eup %2082 }
 0x697   :  { %489 = vrot.lane.b32.xlu0 %v2083_v60, %s2277_s3  ;;  %v2085_v28 = vpop.eup %2084 }
 0x698   :  { %v470_v23 = vadd.f32 1.0, %v2085_v28 }
 0x69a   :  { %2086 = vrcp.f32 %v470_v23 }
 0x6a4   :  { %v2087_v29 = vpop.eup %2086 }
 0x709   :  { %v490_v32 = vpop.permute.xlu0 %489 }
 0x70a   :  { %v492_v34 = vmul.f32 %v2087_v29, %v490_v32 }
 0x70c   :  { %v493_v51 = vpack.c.bf16 %v492_v34, %v492_v34  ;;  %494 = vst.msk [vmem:[#allocation2 + $0x10] sm:$0xff] %vm330_vm3, %v492_v34 }
 0x70d   :  { %495 = vst.msk [vmem:[#allocation2 + $0x28] sm:$0xff] %vm332_vm4, %v492_v34 }
 0x70e   :  { %1937 = vmatmul.mubr.msk.bf16.vlgmr.msra.gmra.mrb[8].mxu1 %vm252_vm5, %v493_v51 }
 0x70f   :  { %664 = vmatpush1.bf16.msra.mxu1 %v2349_v5  ;;  %695 = vmatprep.mubr.bf16.mxu1 %v2276_v1 }
 0x710   :  { %665 = vmatprep.subr.bf16.mxu1 %v2354_v6 }
 0x713   :  { %666 = vmatpush1.bf16.msra.mxu1 %v2363_v7 }
 0x714   :  { %667 = vmatprep.subr.bf16.mxu1 %v2369_v8 }
 0x717   :  { %668 = vmatpush1.bf16.msra.mxu1 %v2381_v10 }
 0x718   :  { %669 = vmatprep.subr.bf16.mxu1 %v2387_v11 }
 0x71b   :  { %670 = vmatpush1.bf16.msra.mxu1 %v2397_v12 }
 0x71c   :  { %825 = vmatprep.subr.bf16.mxu1 %v2344_v4 }
 0x7e1   :  { %v535_v0 = vpop.f32.mrb[8].mxu1 }
 0x7e2   :  { %v542_v36 = vadd.f32 %v535_v0, %v496_v53  ;;  %v537_v37 = vpop.f32.mrb[9].mxu1 }
 0x7e3   :  { %v543_v39 = vadd.f32 %v537_v37, %v497_v56  ;;  %v539_v41 = vpop.f32.mrb[10].mxu1 }
 0x7e4   :  { %v540_v42 = vpop.f32.mrb[11].mxu1  ;;  %v1938_v4 = vmul.f32 -1.442695, %v542_v36 }
 0x7e5   :  { %2088 = vtanh.f32 %v543_v39  ;;  %v1939_v20 = vmul.f32 -1.442695, %v543_v39 }
 0x7e6   :  { %2090 = vpow2.f32 %v1938_v4 }
 0x7ef   :  { %v2089_v45 = vpop.eup %2088 }
 0x7f0   :  { %559 = vrot.lane.b32.xlu1 %v2089_v45, %s2277_s3  ;;  %v2091_v48 = vpop.eup %2090 }
 0x7f1   :  { %v550_v49 = vadd.f32 1.0, %v2091_v48 }
 0x7f3   :  { %2092 = vrcp.f32 %v550_v49 }
 0x7fd   :  { %v2093_v46 = vpop.eup %2092 }
 0x7fe   :  { %v557_v58 = vmul.f32 %v2093_v46, %v486_v3 }
 0x862   :  { %v560_v53 = vpop.permute.xlu1 %559 }
 0x863   :  { %v562_v52 = vmul.f32 %v2093_v46, %v560_v53 }
 0x865   :  { %564 = vrot.lane.b32.xlu0 %v562_v52, %s2277_s3 }
 0x8d7   :  { %v565_v62 = vpop.permute.xlu0 %564 }
 0x8d8   :  { %v567_v15 = vadd.f32 %v565_v62, %v557_v58 }
 0x8da   :  { %2094 = vtanh.f32 %v567_v15 }
 0x8db   :  { %2096 = vpow2.f32 %v1939_v20 }
 0x8e4   :  { %v2095_v56 = vpop.eup %2094 }
 0x8e5   :  { %570 = vrot.lane.b32.xlu1 %v2095_v56, %s2277_s3  ;;  %v2097_v60 = vpop.eup %2096 }
 0x8e6   :  { %v551_v14 = vadd.f32 1.0, %v2097_v60 }
 0x8e8   :  { %2098 = vrcp.f32 %v551_v14 }
 0x8f2   :  { %v2099_v28 = vpop.eup %2098 }
 0x957   :  { %v571_v23 = vpop.permute.xlu1 %570 }
 0x958   :  { %v573_v29 = vmul.f32 %v2099_v28, %v571_v23 }
 0x95a   :  { %v574_v32 = vpack.c.bf16 %v573_v29, %v573_v29  ;;  %575 = vst.msk [vmem:[#allocation2 + $0x18] sm:$0xff] %vm330_vm3, %v573_v29 }
 0x95b   :  { %576 = vst.msk [vmem:[#allocation2 + $0x20] sm:$0xff] %vm332_vm4, %v573_v29 }
 0x95c   :  { %1940 = vmatmul.mubr.msk.bf16.vlgmr.msra.gmra.mrb[20].mxu0 %vm252_vm5, %v574_v32 }
 0x95d   :  { %745 = vmatpush1.bf16.msra.mxu0 %v2349_v5  ;;  %776 = vmatprep.mubr.bf16.mxu0 %v2276_v1 }
 0x95e   :  { %746 = vmatprep.subr.bf16.mxu0 %v2354_v6 }
 0x961   :  { %747 = vmatpush1.bf16.msra.mxu0 %v2363_v7 }
 0x962   :  { %748 = vmatprep.subr.bf16.mxu0 %v2369_v8 }
 0x965   :  { %749 = vmatpush1.bf16.msra.mxu0 %v2381_v10 }
 0x966   :  { %750 = vmatprep.subr.bf16.mxu0 %v2387_v11 }
 0x969   :  { %751 = vmatpush1.bf16.msra.mxu0 %v2397_v12 }
 0x96a   :  { %984 = vmatprep.subr.bf16.mxu0 %v2030_v26 }
 0xa2f   :  { %v616_v3 = vpop.f32.mrb[20].mxu0 }
 0xa30   :  { %v623_v34 = vadd.f32 %v616_v3, %v577_v54  ;;  %v618_v51 = vpop.f32.mrb[21].mxu0 }
 0xa31   :  { %v624_v0 = vadd.f32 %v618_v51, %v578_v57  ;;  %v620_v36 = vpop.f32.mrb[22].mxu0 }
 0xa32   :  { %v621_v37 = vpop.f32.mrb[23].mxu0  ;;  %v1941_v41 = vmul.f32 -1.442695, %v623_v34 }
 0xa33   :  { %2100 = vtanh.f32 %v624_v0  ;;  %v1942_v57 = vmul.f32 -1.442695, %v624_v0 }
 0xa34   :  { %2102 = vpow2.f32 %v1941_v41 }
 0xa3d   :  { %v2101_v39 = vpop.eup %2100 }
 0xa3e   :  { %640 = vrot.lane.b32.xlu0 %v2101_v39, %s2277_s3  ;;  %v2103_v42 = vpop.eup %2102 }
 0xa3f   :  { %v631_v45 = vadd.f32 1.0, %v2103_v42 }
 0xa41   :  { %2104 = vrcp.f32 %v631_v45 }
 0xa4b   :  { %v2105_v35 = vpop.eup %2104 }
 0xa4c   :  { %v638_v4 = vmul.f32 %v2105_v35, %v567_v15 }
 0xab0   :  { %v641_v44 = vpop.permute.xlu0 %640 }
 0xab1   :  { %v643_v54 = vmul.f32 %v2105_v35, %v641_v44 }
 0xab3   :  { %645 = vrot.lane.b32.xlu1 %v643_v54, %s2277_s3 }
 0xb25   :  { %v646_v48 = vpop.permute.xlu1 %645 }
 0xb26   :  { %v648_v38 = vadd.f32 %v646_v48, %v638_v4 }
 0xb28   :  { %2106 = vtanh.f32 %v648_v38 }
 0xb29   :  { %2108 = vpow2.f32 %v1942_v57 }
 0xb32   :  { %v2107_v47 = vpop.eup %2106 }
 0xb33   :  { %651 = vrot.lane.b32.xlu0 %v2107_v47, %s2277_s3  ;;  %v2109_v49 = vpop.eup %2108 }
 0xb34   :  { %v632_v46 = vadd.f32 1.0, %v2109_v49 }
 0xb36   :  { %2110 = vrcp.f32 %v632_v46 }
 0xb40   :  { %v2111_v53 = vpop.eup %2110 }
 0xba5   :  { %v652_v52 = vpop.permute.xlu0 %651 }
 0xba6   :  { %v654_v58 = vmul.f32 %v2111_v53, %v652_v52 }
 0xba8   :  { %v655_v62 = vpack.c.bf16 %v654_v58, %v654_v58  ;;  %656 = vst.msk [vmem:[#allocation2 + $0x20] sm:$0xff] %vm330_vm3, %v654_v58 }
 0xba9   :  { %657 = vst.msk [vmem:[#allocation2 + $0x18] sm:$0xff] %vm332_vm4, %v654_v58 }
 0xbaa   :  { %1943 = vmatmul.mubr.msk.bf16.vlgmr.msra.gmra.mrb[12].mxu1 %vm252_vm5, %v655_v62 }
 0xbab   :  { %826 = vmatpush1.bf16.msra.mxu1 %v2349_v5  ;;  %857 = vmatprep.mubr.bf16.mxu1 %v2276_v1 }
 0xbac   :  { %827 = vmatprep.subr.bf16.mxu1 %v2354_v6 }
 0xbaf   :  { %828 = vmatpush1.bf16.msra.mxu1 %v2363_v7 }
 0xbb0   :  { %829 = vmatprep.subr.bf16.mxu1 %v2369_v8 }
 0xbb3   :  { %830 = vmatpush1.bf16.msra.mxu1 %v2381_v10 }
 0xbb4   :  { %831 = vmatprep.subr.bf16.mxu1 %v2387_v11 }
 0xbb7   :  { %832 = vmatpush1.bf16.msra.mxu1 %v2397_v12 }
 0xc7d   :  { %v697_v15 = vpop.f32.mrb[12].mxu1 }
 0xc7e   :  { %v704_v5 = vadd.f32 %v697_v15, %v658_v59  ;;  %v699_v56 = vpop.f32.mrb[13].mxu1 }
 0xc7f   :  { %v705_v6 = vadd.f32 %v699_v56, %v659_v61  ;;  %v701_v7 = vpop.f32.mrb[14].mxu1 }
 0xc80   :  { %v702_v8 = vpop.f32.mrb[15].mxu1  ;;  %v1944_v11 = vmul.f32 -1.442695, %v704_v5 }
 0xc81   :  { %2112 = vtanh.f32 %v705_v6  ;;  %v1945_v61 = vmul.f32 -1.442695, %v705_v6 }
 0xc82   :  { %2114 = vpow2.f32 %v1944_v11 }
 0xc8b   :  { %v2113_v10 = vpop.eup %2112 }
 0xc8c   :  { %721 = vrot.lane.b32.xlu1 %v2113_v10, %s2277_s3  ;;  %v2115_v12 = vpop.eup %2114  ;;  %v2033_v10 = vld [vmem:[%s3116_s4 + $0x14] ss:$8 sps:$4 sm:$0xff]  }
 0xc8d   :  { %v712_v20 = vadd.f32 1.0, %v2115_v12  ;;  %v2031_v12 = vld [vmem:[%s3116_s4 + $0x10] ss:$8 sps:$4 sm:$0xff]  }
 0xc8f   :  { %2116 = vrcp.f32 %v712_v20 }
 0xc99   :  { %v2117_v31 = vpop.eup %2116 }
 0xc9a   :  { %v719_v60 = vmul.f32 %v2117_v31, %v648_v38 }
 0xcfe   :  { %v722_v50 = vpop.permute.xlu1 %721 }
 0xcff   :  { %v724_v59 = vmul.f32 %v2117_v31, %v722_v50  ;;  %v2034_v31 = vld [vmem:[%s3116_s4 + $0x20] ss:$8 sps:$4 sm:$0xff]   ;;  %v2036_v50 = vld [vmem:[%s3116_s4 + $0x24] ss:$8 sps:$4 sm:$0xff]  }
 0xd01   :  { %726 = vrot.lane.b32.xlu0 %v724_v59, %s2277_s3  ;;  %v2039_v59 = vld [vmem:[%s3116_s4 + $0x34] ss:$8 sps:$4 sm:$0xff]  }
 0xd73   :  { %v727_v14 = vpop.permute.xlu0 %726 }
 0xd74   :  { %v729_v33 = vadd.f32 %v727_v14, %v719_v60  ;;  %v2037_v60 = vld [vmem:[%s3116_s4 + $0x30] ss:$8 sps:$4 sm:$0xff]  }
 0xd76   :  { %2118 = vtanh.f32 %v729_v33 }
 0xd77   :  { %2120 = vpow2.f32 %v1945_v61  ;;  %v2732_v61 = vld [vmem:[%s3117_s5 + $0x14] ss:$8 sps:$4 sm:$0xff]  }
 0xd80   :  { %v2119_v55 = vpop.eup %2118 }
 0xd81   :  { %732 = vrot.lane.b32.xlu1 %v2119_v55, %s2277_s3  ;;  %v2121_v28 = vpop.eup %2120  ;;  %v2726_v55 = vld [vmem:[%s3117_s5] ss:$8 sps:$4 sm:$0xff]  }
 0xd82   :  { %v713_v23 = vadd.f32 1.0, %v2121_v28  ;;  %v2737_v28 = vld [vmem:[%s3117_s5 + $0x10] ss:$8 sps:$4 sm:$0xff]  }
 0xd84   :  { %2122 = vrcp.f32 %v713_v23  ;;  %v2746_v23 = vld [vmem:[%s3117_s5 + $0x24] ss:$8 sps:$4 sm:$0xff]  }
 0xd8e   :  { %v2123_v29 = vpop.eup %2122 }
 0xdf3   :  { %v733_v32 = vpop.permute.xlu1 %732 }
 0xdf4   :  { %v735_v3 = vmul.f32 %v2123_v29, %v733_v32  ;;  %v2751_v29 = vld [vmem:[%s3117_s5 + $0x20] ss:$8 sps:$4 sm:$0xff]   ;;  %v2756_v32 = vld [vmem:[%s3117_s5 + $0x34] ss:$8 sps:$4 sm:$0xff]  }
 0xdf6   :  { %v736_v34 = vpack.c.bf16 %v735_v3, %v735_v3  ;;  %737 = vst.msk [vmem:[#allocation2 + $0x28] sm:$0xff] %vm330_vm3, %v735_v3 }
 0xdf7   :  { %738 = vst.msk [vmem:[#allocation2 + $0x10] sm:$0xff] %vm332_vm4, %v735_v3  ;;  %v2763_v3 = vld [vmem:[%s3117_s5 + $0x30] ss:$8 sps:$4 sm:$0xff]  }
 0xdf8   :  { %1946 = vmatmul.mubr.msk.bf16.vlgmr.msra.gmra.mrb[24].mxu0 %vm252_vm5, %v736_v34 }
 0xdf9   :  { %1016 = vmatprep.mubr.bf16.mxu0 %v2276_v1  ;;  %985 = vmatpush1.bf16.msra.mxu0 %v2028_v24 }
 0xdfa   :  { %986 = vmatprep.subr.bf16.mxu0 %v2033_v10 }
 0xdfd   :  { %987 = vmatpush1.bf16.msra.mxu0 %v2031_v12 }
 0xdfe   :  { %988 = vmatprep.subr.bf16.mxu0 %v2036_v50 }
 0xe01   :  { %989 = vmatpush1.bf16.msra.mxu0 %v2034_v31 }
 0xe02   :  { %990 = vmatprep.subr.bf16.mxu0 %v2039_v59 }
 0xe05   :  { %991 = vmatpush1.bf16.msra.mxu0 %v2037_v60 }
 0xecb   :  { %v778_v51 = vpop.f32.mrb[24].mxu0 }
 0xecc   :  { %v785_v0 = vadd.f32 %v778_v51, %v739_v18  ;;  %v780_v36 = vpop.f32.mrb[25].mxu0 }
 0xecd   :  { %v786_v37 = vadd.f32 %v780_v36, %v740_v21  ;;  %v782_v39 = vpop.f32.mrb[26].mxu0 }
 0xece   :  { %v783_v41 = vpop.f32.mrb[27].mxu0  ;;  %v1947_v45 = vmul.f32 -1.442695, %v785_v0 }
 0xecf   :  { %2124 = vtanh.f32 %v786_v37  ;;  %v1948_v21 = vmul.f32 -1.442695, %v786_v37 }
 0xed0   :  { %2126 = vpow2.f32 %v1947_v45 }
 0xed9   :  { %v2125_v42 = vpop.eup %2124 }
 0xeda   :  { %802 = vrot.lane.b32.xlu0 %v2125_v42, %s2277_s3  ;;  %v2127_v35 = vpop.eup %2126 }
 0xedb   :  { %v793_v44 = vadd.f32 1.0, %v2127_v35  ;;  %v902_v35 = vld [vmem:[#allocation2 + $0x10] sm:$0xff] }
 0xedd   :  { %2128 = vrcp.f32 %v793_v44  ;;  %v903_v44 = vld [vmem:[#allocation2 + $0x18] sm:$0xff] }
 0xee7   :  { %v2129_v25 = vpop.eup %2128 }
 0xee8   :  { %v800_v54 = vmul.f32 %v2129_v25, %v729_v33  ;;  %v2721_v33 = vld [vmem:[%s3117_s5 + $0x4] ss:$8 sps:$4 sm:$0xff]  }
 0xee9   :  { %1107 = vmatprep.subr.bf16.mxu1 %v2721_v33  ;;  %1269 = vmatprep.subr.bf16.mxu0 %v2721_v33 }
 0xf4c   :  { %v803_v63 = vpop.permute.xlu0 %802 }
 0xf4d   :  { %v805_v18 = vmul.f32 %v2129_v25, %v803_v63  ;;  %v909_v25 = vpack.c.bf16 %v903_v44, %v902_v35  ;;  %v905_v63 = vld [vmem:[#allocation2 + $0x28] sm:$0xff] }
 0xf4f   :  { %807 = vrot.lane.b32.xlu1 %v805_v18, %s2277_s3  ;;  %v904_v18 = vld [vmem:[#allocation2 + $0x20] sm:$0xff] }
 0xfc1   :  { %v808_v4 = vpop.permute.xlu1 %807 }
 0xfc2   :  { %v810_v27 = vadd.f32 %v808_v4, %v800_v54  ;;  %v910_v54 = vpack.c.bf16 %v905_v63, %v904_v18 }
 0xfc4   :  { %2130 = vtanh.f32 %v810_v27 }
 0xfc5   :  { %2132 = vpow2.f32 %v1948_v21 }
 0xfce   :  { %v2131_v2 = vpop.eup %2130 }
 0xfcf   :  { %813 = vrot.lane.b32.xlu0 %v2131_v2, %s2277_s3  ;;  %v2133_v48 = vpop.eup %2132 }
 0xfd0   :  { %v794_v38 = vadd.f32 1.0, %v2133_v48 }
 0xfd2   :  { %2134 = vrcp.f32 %v794_v38 }
 0xfdc   :  { %v2135_v47 = vpop.eup %2134 }
0x1041   :  { %v814_v57 = vpop.permute.xlu0 %813 }
0x1042   :  { %v816_v49 = vmul.f32 %v2135_v47, %v814_v57  ;;  %v920_v57 = vld [vmem:[%s3118_s6] sm:$0x3] }
0x1044   :  { %v817_v46 = vpack.c.bf16 %v816_v49, %v816_v49  ;;  %818 = vst.msk [vmem:[#allocation2 + $0x30] sm:$0xff] %vm330_vm3, %v816_v49 }
0x1045   :  { %819 = vst.msk [vmem:[#allocation2 + $0x8] sm:$0xff] %vm332_vm4, %v816_v49 }
0x1046   :  { %1949 = vmatmul.mubr.msk.bf16.vlgmr.msra.gmra.mrb[16].mxu1 %vm252_vm5, %v817_v46  ;;  %v925_v46 = vrot.slane %v920_v57, %v78_v17 }
0x1047   :  { %1139 = vmatprep.mubr.bf16.mxu1 %v2276_v1  ;;  %1108 = vmatpush1.bf16.msra.mxu1 %v2726_v55 }
0x1048   :  { %1109 = vmatprep.subr.bf16.mxu1 %v2732_v61 }
0x104b   :  { %1110 = vmatpush1.bf16.msra.mxu1 %v2737_v28 }
0x104c   :  { %1111 = vmatprep.subr.bf16.mxu1 %v2746_v23  ;;  %v901_v42 = vld [vmem:[#allocation2 + $0x8] sm:$0xff] }
0x104f   :  { %1112 = vmatpush1.bf16.msra.mxu1 %v2751_v29 }
0x1050   :  { %1113 = vmatprep.subr.bf16.mxu1 %v2756_v32 }
0x1053   :  { %1114 = vmatpush1.bf16.msra.mxu1 %v2763_v3 }
0x1054   :  { %1188 = vmatprep.subr.bf16.mxu1 %v2721_v33 }
0x1056   :  { %1140 = vmatmul.mubr.bf16.vlgmr.msra.gmra.mrb[20].mxu1 %v2276_v1 }
0x1057   :  { %1189 = vmatpush1.bf16.msra.mxu1 %v2726_v55  ;;  %1220 = vmatprep.mubr.bf16.mxu1 %v2276_v1 }
0x1058   :  { %1190 = vmatprep.subr.bf16.mxu1 %v2732_v61 }
0x105b   :  { %1191 = vmatpush1.bf16.msra.mxu1 %v2737_v28 }
0x105c   :  { %1192 = vmatprep.subr.bf16.mxu1 %v2746_v23 }
0x105f   :  { %1193 = vmatpush1.bf16.msra.mxu1 %v2751_v29 }
0x1060   :  { %1194 = vmatprep.subr.bf16.mxu1 %v2756_v32 }
0x1063   :  { %1195 = vmatpush1.bf16.msra.mxu1 %v2763_v3 }
0x1064   :  { %1350 = vmatprep.subr.bf16.mxu1 %v2721_v33 }
0x1119   :  { %v859_v53 = vpop.f32.mrb[16].mxu1 }
0x111a   :  { %v866_v52 = vadd.f32 %v859_v53, %v820_v22  ;;  %v861_v58 = vpop.f32.mrb[17].mxu1 }
0x111b   :  { %v2688_v62 = vadd.f32 %v861_v58, %v821_v30  ;;  %v863_v15 = vpop.f32.mrb[18].mxu1 }
0x111c   :  { %v864_v5 = vpop.f32.mrb[19].mxu1  ;;  %v1950_v6 = vmul.f32 -1.442695, %v866_v52  ;;  %v929_v52 = vrot.slane %v920_v57, %v82_v19 }
0x111d   :  { %2136 = vtanh.f32 %v2688_v62  ;;  %v1951_v34 = vmul.f32 -1.442695, %v2688_v62 }
0x111e   :  { %2138 = vpow2.f32 %v1950_v6 }
0x1127   :  { %v2137_v56 = vpop.eup %2136 }
0x1128   :  { %883 = vrot.lane.b32.xlu1 %v2137_v56, %s2277_s3  ;;  %v2139_v7 = vpop.eup %2138 }
0x1129   :  { %v874_v9 = vadd.f32 1.0, %v2139_v7  ;;  %v1141_v21 = vpop.f32.mrb[20].mxu1 }
0x112a   :  { %v1143_v48 = vpop.f32.mrb[21].mxu1 }
0x112b   :  { %2140 = vrcp.f32 %v874_v9  ;;  %v1145_v38 = vpop.f32.mrb[22].mxu1 }
0x112c   :  { %v1146_v47 = vpop.f32.mrb[23].mxu1 }
0x1135   :  { %v2141_v13 = vpop.eup %2140 }
0x1136   :  { %v881_v30 = vmul.f32 %v2141_v13, %v810_v27  ;;  %v906_v27 = vld [vmem:[#allocation2 + $0x30] sm:$0xff] }
0x119a   :  { %v884_v22 = vpop.permute.xlu1 %883 }
0x119b   :  { %v886_v8 = vmul.f32 %v2141_v13, %v884_v22 }
0x119d   :  { %888 = vrot.lane.b32.xlu0 %v886_v8, %s2277_s3 }
0x120f   :  { %v889_v11 = vpop.permute.xlu0 %888 }
0x1210   :  { %v891_v20 = vadd.f32 %v889_v11, %v881_v30 }
0x1212   :  { %2142 = vtanh.f32 %v891_v20 }
0x1213   :  { %2144 = vpow2.f32 %v1951_v34 }
0x121c   :  { %v2143_v14 = vpop.eup %2142 }
0x121d   :  { %894 = vrot.lane.b32.xlu1 %v2143_v14, %s2277_s3  ;;  %v2145_v51 = vpop.eup %2144 }
0x121e   :  { %v875_v0 = vadd.f32 1.0, %v2145_v51 }
0x1220   :  { %2146 = vrcp.f32 %v875_v0 }
0x122a   :  { %v2147_v36 = vpop.eup %2146 }
0x128f   :  { %v895_v37 = vpop.permute.xlu1 %894 }
0x1290   :  { %v897_v39 = vmul.f32 %v2147_v36, %v895_v37 }
0x1292   :  { %898 = vst.msk [vmem:[#allocation2 + $0x38] sm:$0xff] %vm330_vm3, %v897_v39 }
0x1293   :  { %899 = vst.msk [vmem:[#allocation2] sm:$0xff] %vm332_vm4, %v897_v39 }
0x1299   :  { %v907_v4 = vld [vmem:[#allocation2 + $0x38] sm:$0xff] }
0x129a   :  { %v900_v41 = vld [vmem:[#allocation2] sm:$0xff]  ;;  %v911_v2 = vpack.c.bf16 %v907_v4, %v906_v27 }
0x129b   :  { %v908_v45 = vpack.c.bf16 %v901_v42, %v900_v41 }
0x129d   :  { %1960 = vmatmul.mubr.msk.bf16.vlgmr.msra.gmra.mrb[28].mxu0 %vm252_vm5, %v908_v45 }
0x129e   :  { %1026 = vmatprep.mubr.bf16.mxu0 %v2276_v1  ;;  %1270 = vmatpush1.bf16.msra.mxu0 %v2726_v55 }
0x129f   :  { %1271 = vmatprep.subr.bf16.mxu0 %v2732_v61 }
0x12a2   :  { %1272 = vmatpush1.bf16.msra.mxu0 %v2737_v28 }
0x12a3   :  { %1273 = vmatprep.subr.bf16.mxu0 %v2746_v23 }
0x12a5   :  { %1961 = vmatmul.mubr.msk.bf16.gmra.mrb[32].mxu0 %vm252_vm5, %v909_v25 }
0x12a6   :  { %1036 = vmatprep.mubr.bf16.mxu0 %v2276_v1  ;;  %1274 = vmatpush1.bf16.msra.mxu0 %v2751_v29 }
0x12a7   :  { %1275 = vmatprep.subr.bf16.mxu0 %v2756_v32 }
0x12aa   :  { %1276 = vmatpush1.bf16.msra.mxu0 %v2763_v3 }
0x12ab   :  { %1431 = vmatprep.subr.bf16.mxu0 %v2721_v33 }
0x12ad   :  { %1962 = vmatmul.mubr.msk.bf16.gmra.mrb[36].mxu0 %vm252_vm5, %v910_v54 }
0x12ae   :  { %1046 = vmatprep.mubr.bf16.mxu0 %v2276_v1 }
0x12b5   :  { %1963 = vmatmul.mubr.msk.bf16.gmra.mrb[40].mxu0 %vm252_vm5, %v911_v2 }
0x12b6   :  { %1301 = vmatprep.mubr.bf16.mxu0 %v2276_v1 }
0x1370   :  { %v1018_v49 = vpop.f32.mrb[28].mxu0 }
0x1371   :  { %v1020_v53 = vpop.f32.mrb[29].mxu0  ;;  %v2860_v42 = vadd.f32 %v1018_v49, %v925_v46 }
0x1372   :  { %v1022_v58 = vpop.f32.mrb[30].mxu0  ;;  %v2872_v63 = vadd.f32 %v1020_v53, %v929_v52 }
0x1373   :  { %v2804_v62 = vadd.f32 %v1022_v58, %v925_v46  ;;  %v1024_v15 = vpop.f32.mrb[31].mxu0 }
0x1374   :  { %v2806_v5 = vadd.f32 %v1024_v15, %v929_v52 }
0x1378   :  { %v1028_v56 = vpop.f32.mrb[32].mxu0 }
0x1379   :  { %v2808_v6 = vadd.f32 %v1028_v56, %v925_v46  ;;  %v1030_v7 = vpop.f32.mrb[33].mxu0 }
0x137a   :  { %v2810_v9 = vadd.f32 %v1030_v7, %v929_v52  ;;  %v1032_v13 = vpop.f32.mrb[34].mxu0 }
0x137b   :  { %v2812_v22 = vadd.f32 %v1032_v13, %v925_v46  ;;  %v1034_v17 = vpop.f32.mrb[35].mxu0 }
0x137c   :  { %v2814_v8 = vadd.f32 %v1034_v17, %v929_v52 }
0x1380   :  { %v1038_v16 = vpop.f32.mrb[36].mxu0 }
0x1381   :  { %v2816_v19 = vadd.f32 %v1038_v16, %v925_v46  ;;  %v1040_v24 = vpop.f32.mrb[37].mxu0 }
0x1382   :  { %v2818_v26 = vadd.f32 %v1040_v24, %v929_v52  ;;  %v1042_v30 = vpop.f32.mrb[38].mxu0 }
0x1383   :  { %v2820_v10 = vadd.f32 %v1042_v30, %v925_v46  ;;  %v1044_v11 = vpop.f32.mrb[39].mxu0  ;;  %v1345_v12 = vsel %vm2449_vm1, %v2812_v22, %v2816_v19  ;;  %v1426_v20 = vsel %vm2449_vm1, %v2816_v19, %v2812_v22 }
0x1384   :  { %v2830_v31 = vadd.f32 %v1044_v11, %v929_v52  ;;  %v1346_v50 = vsel %vm2453_vm2, %v2814_v8, %v2818_v26  ;;  %v1427_v59 = vsel %vm2453_vm2, %v2818_v26, %v2814_v8 }
0x1385   :  { %v1264_v60 = vsel %vm2449_vm1, %v2808_v6, %v2820_v10  ;;  %v1507_v14 = vsel %vm2449_vm1, %v2820_v10, %v2808_v6 }
0x1386   :  { %v1265_v34 = vsel %vm2453_vm2, %v2810_v9, %v2830_v31  ;;  %v1508_v51 = vsel %vm2453_vm2, %v2830_v31, %v2810_v9 }
0x1388   :  { %v1048_v0 = vpop.f32.mrb[40].mxu0 }
0x1389   :  { %v2856_v36 = vadd.f32 %v1048_v0, %v925_v46  ;;  %v1050_v37 = vpop.f32.mrb[41].mxu0 }
0x138a   :  { %v2858_v39 = vadd.f32 %v1050_v37, %v929_v52  ;;  %v1052_v41 = vpop.f32.mrb[42].mxu0 }
0x138b   :  { %v2862_v45 = vadd.f32 %v1052_v41, %v925_v46  ;;  %v1054_v35 = vpop.f32.mrb[43].mxu0  ;;  %v1183_v44 = vsel %vm2449_vm1, %v2804_v62, %v2856_v36  ;;  %v1588_v25 = vsel %vm2449_vm1, %v2856_v36, %v2804_v62 }
0x138c   :  { %v2874_v18 = vadd.f32 %v1054_v35, %v929_v52  ;;  %v1184_v54 = vsel %vm2453_vm2, %v2806_v5, %v2858_v39  ;;  %v1589_v4 = vsel %vm2453_vm2, %v2858_v39, %v2806_v5 }
0x138d   :  { %v1065_v27 = vsel %vm2449_vm1, %v2860_v42, %v2862_v45  ;;  %v1669_v2 = vsel %vm2449_vm1, %v2862_v45, %v2860_v42 }
0x138e   :  { %v1148_v38 = vadd.f32 %v1141_v21, %v1065_v27  ;;  %v1066_v47 = vsel %vm2453_vm2, %v2872_v63, %v2874_v18  ;;  %v1670_v57 = vsel %vm2453_vm2, %v2874_v18, %v2872_v63  ;;  %v3053_v18 = vld [vmem:[%s3119_s7] ss:$0 sm:$0xff] }
0x138f   :  { %v1149_v49 = vadd.f32 %v1143_v48, %v1066_v47 }
0x1390   :  { %v1972_v53 = vmul.f32 -1.442695, %v1148_v38 }
0x1391   :  { %2148 = vtanh.f32 %v1149_v49  ;;  %v1973_v48 = vmul.f32 -1.442695, %v1149_v49 }
0x1392   :  { %2150 = vpow2.f32 %v1972_v53 }
0x139b   :  { %v2149_v46 = vpop.eup %2148 }
0x139c   :  { %1165 = vrot.lane.b32.xlu0 %v2149_v46, %s2277_s3  ;;  %v2151_v52 = vpop.eup %2150 }
0x139d   :  { %v1156_v58 = vadd.f32 1.0, %v2151_v52 }
0x139f   :  { %2152 = vrcp.f32 %v1156_v58 }
0x13a9   :  { %v2153_v21 = vpop.eup %2152 }
0x13aa   :  { %v1163_v7 = vmul.f32 0.0, %v2153_v21 }
0x140e   :  { %v1166_v15 = vpop.permute.xlu0 %1165 }
0x140f   :  { %v1168_v56 = vmul.f32 %v2153_v21, %v1166_v15 }
0x1411   :  { %1170 = vrot.lane.b32.xlu1 %v1168_v56, %s2277_s3 }
0x1483   :  { %v1171_v13 = vpop.permute.xlu1 %1170 }
0x1484   :  { %v1173_v17 = vadd.f32 %v1171_v13, %v1163_v7 }
0x1486   :  { %2154 = vtanh.f32 %v1173_v17 }
0x1487   :  { %2156 = vpow2.f32 %v1973_v48 }
0x1490   :  { %v2155_v16 = vpop.eup %2154 }
0x1491   :  { %1176 = vrot.lane.b32.xlu0 %v2155_v16, %s2277_s3  ;;  %v2157_v24 = vpop.eup %2156 }
0x1492   :  { %v1157_v30 = vadd.f32 1.0, %v2157_v24 }
0x1494   :  { %2158 = vrcp.f32 %v1157_v30 }
0x149e   :  { %v2159_v11 = vpop.eup %2158 }
0x1503   :  { %v1177_v0 = vpop.permute.xlu0 %1176 }
0x1504   :  { %v1179_v37 = vmul.f32 %v2159_v11, %v1177_v0 }
0x1506   :  { %v1180_v41 = vpack.c.bf16 %v1179_v37, %v1179_v37  ;;  %1181 = vst.msk [vmem:[#allocation2] sm:$0xff] %vm330_vm3, %v1179_v37 }
0x1507   :  { %1182 = vst.msk [vmem:[#allocation2 + $0x38] sm:$0xff] %vm332_vm4, %v1179_v37 }
0x1508   :  { %1974 = vmatmul.mubr.msk.bf16.vlgmr.msra.gmra.mrb[24].mxu1 %vm252_vm5, %v1180_v41 }
0x1509   :  { %1351 = vmatpush1.bf16.msra.mxu1 %v2726_v55  ;;  %1382 = vmatprep.mubr.bf16.mxu1 %v2276_v1 }
0x150a   :  { %1352 = vmatprep.subr.bf16.mxu1 %v2732_v61 }
0x150d   :  { %1353 = vmatpush1.bf16.msra.mxu1 %v2737_v28 }
0x150e   :  { %1354 = vmatprep.subr.bf16.mxu1 %v2746_v23 }
0x1511   :  { %1355 = vmatpush1.bf16.msra.mxu1 %v2751_v29 }
0x1512   :  { %1356 = vmatprep.subr.bf16.mxu1 %v2756_v32 }
0x1515   :  { %1357 = vmatpush1.bf16.msra.mxu1 %v2763_v3 }
0x1516   :  { %1512 = vmatprep.subr.bf16.mxu1 %v2721_v33 }
0x15db   :  { %v1222_v35 = vpop.f32.mrb[24].mxu1 }
0x15dc   :  { %v1229_v27 = vadd.f32 %v1222_v35, %v1183_v44  ;;  %v1224_v38 = vpop.f32.mrb[25].mxu1 }
0x15dd   :  { %v1230_v47 = vadd.f32 %v1224_v38, %v1184_v54  ;;  %v1226_v49 = vpop.f32.mrb[26].mxu1 }
0x15de   :  { %v1227_v46 = vpop.f32.mrb[27].mxu1  ;;  %v1975_v52 = vmul.f32 -1.442695, %v1229_v27 }
0x15df   :  { %2160 = vtanh.f32 %v1230_v47  ;;  %v1976_v48 = vmul.f32 -1.442695, %v1230_v47 }
0x15e0   :  { %2162 = vpow2.f32 %v1975_v52 }
0x15e9   :  { %v2161_v53 = vpop.eup %2160 }
0x15ea   :  { %1246 = vrot.lane.b32.xlu1 %v2161_v53, %s2277_s3  ;;  %v2163_v58 = vpop.eup %2162 }
0x15eb   :  { %v1237_v21 = vadd.f32 1.0, %v2163_v58 }
0x15ed   :  { %2164 = vrcp.f32 %v1237_v21 }
0x15f7   :  { %v2165_v15 = vpop.eup %2164 }
0x15f8   :  { %v1244_v13 = vmul.f32 %v2165_v15, %v1173_v17 }
0x165c   :  { %v1247_v56 = vpop.permute.xlu1 %1246 }
0x165d   :  { %v1249_v7 = vmul.f32 %v2165_v15, %v1247_v56 }
0x165f   :  { %1251 = vrot.lane.b32.xlu0 %v1249_v7, %s2277_s3 }
0x16d1   :  { %v1252_v44 = vpop.permute.xlu0 %1251 }
0x16d2   :  { %v1254_v16 = vadd.f32 %v1252_v44, %v1244_v13 }
0x16d4   :  { %2166 = vtanh.f32 %v1254_v16 }
0x16d5   :  { %2168 = vpow2.f32 %v1976_v48 }
0x16de   :  { %v2167_v54 = vpop.eup %2166 }
0x16df   :  { %1257 = vrot.lane.b32.xlu1 %v2167_v54, %s2277_s3  ;;  %v2169_v24 = vpop.eup %2168 }
0x16e0   :  { %v1238_v30 = vadd.f32 1.0, %v2169_v24 }
0x16e2   :  { %2170 = vrcp.f32 %v1238_v30 }
0x16ec   :  { %v2171_v11 = vpop.eup %2170 }
0x1751   :  { %v1258_v0 = vpop.permute.xlu1 %1257 }
0x1752   :  { %v1260_v37 = vmul.f32 %v2171_v11, %v1258_v0 }
0x1754   :  { %v1261_v41 = vpack.c.bf16 %v1260_v37, %v1260_v37  ;;  %1262 = vst.msk [vmem:[#allocation2 + $0x8] sm:$0xff] %vm330_vm3, %v1260_v37 }
0x1755   :  { %1263 = vst.msk [vmem:[#allocation2 + $0x30] sm:$0xff] %vm332_vm4, %v1260_v37 }
0x1756   :  { %1977 = vmatmul.mubr.msk.bf16.vlgmr.msra.gmra.mrb[44].mxu0 %vm252_vm5, %v1261_v41 }
0x1757   :  { %1432 = vmatpush1.bf16.msra.mxu0 %v2726_v55  ;;  %1463 = vmatprep.mubr.bf16.mxu0 %v2276_v1 }
0x1758   :  { %1433 = vmatprep.subr.bf16.mxu0 %v2732_v61 }
0x175b   :  { %1434 = vmatpush1.bf16.msra.mxu0 %v2737_v28 }
0x175c   :  { %1435 = vmatprep.subr.bf16.mxu0 %v2746_v23 }
0x175f   :  { %1436 = vmatpush1.bf16.msra.mxu0 %v2751_v29 }
0x1760   :  { %1437 = vmatprep.subr.bf16.mxu0 %v2756_v32 }
0x1763   :  { %1438 = vmatpush1.bf16.msra.mxu0 %v2763_v3 }
0x1764   :  { %1593 = vmatprep.subr.bf16.mxu0 %v2721_v33 }
0x1829   :  { %v1303_v17 = vpop.f32.mrb[44].mxu0 }
0x182a   :  { %v1310_v35 = vadd.f32 %v1303_v17, %v1264_v60  ;;  %v1305_v27 = vpop.f32.mrb[45].mxu0 }
0x182b   :  { %v1311_v38 = vadd.f32 %v1305_v27, %v1265_v34  ;;  %v1307_v47 = vpop.f32.mrb[46].mxu0 }
0x182c   :  { %v1308_v49 = vpop.f32.mrb[47].mxu0  ;;  %v1978_v53 = vmul.f32 -1.442695, %v1310_v35 }
0x182d   :  { %2172 = vtanh.f32 %v1311_v38  ;;  %v1979_v44 = vmul.f32 -1.442695, %v1311_v38 }
0x182e   :  { %2174 = vpow2.f32 %v1978_v53 }
0x1837   :  { %v2173_v46 = vpop.eup %2172 }
0x1838   :  { %1327 = vrot.lane.b32.xlu0 %v2173_v46, %s2277_s3  ;;  %v2175_v52 = vpop.eup %2174 }
0x1839   :  { %v1318_v58 = vadd.f32 1.0, %v2175_v52 }
0x183b   :  { %2176 = vrcp.f32 %v1318_v58 }
0x1845   :  { %v2177_v21 = vpop.eup %2176 }
0x1846   :  { %v1325_v56 = vmul.f32 %v2177_v21, %v1254_v16 }
0x18aa   :  { %v1328_v60 = vpop.permute.xlu0 %1327 }
0x18ab   :  { %v1330_v15 = vmul.f32 %v2177_v21, %v1328_v60 }
0x18ad   :  { %1332 = vrot.lane.b32.xlu1 %v1330_v15, %s2277_s3 }
0x191f   :  { %v1333_v7 = vpop.permute.xlu1 %1332 }
0x1920   :  { %v1335_v13 = vadd.f32 %v1333_v7, %v1325_v56 }
0x1922   :  { %2178 = vtanh.f32 %v1335_v13 }
0x1923   :  { %2180 = vpow2.f32 %v1979_v44 }
0x192c   :  { %v2179_v34 = vpop.eup %2178 }
0x192d   :  { %1338 = vrot.lane.b32.xlu0 %v2179_v34, %s2277_s3  ;;  %v2181_v54 = vpop.eup %2180 }
0x192e   :  { %v1319_v48 = vadd.f32 1.0, %v2181_v54 }
0x1930   :  { %2182 = vrcp.f32 %v1319_v48 }
0x193a   :  { %v2183_v24 = vpop.eup %2182 }
0x199f   :  { %v1339_v30 = vpop.permute.xlu0 %1338 }
0x19a0   :  { %v1341_v11 = vmul.f32 %v2183_v24, %v1339_v30 }
0x19a2   :  { %v1342_v0 = vpack.c.bf16 %v1341_v11, %v1341_v11  ;;  %1343 = vst.msk [vmem:[#allocation2 + $0x10] sm:$0xff] %vm330_vm3, %v1341_v11 }
0x19a3   :  { %1344 = vst.msk [vmem:[#allocation2 + $0x28] sm:$0xff] %vm332_vm4, %v1341_v11 }
0x19a4   :  { %1980 = vmatmul.mubr.msk.bf16.vlgmr.msra.gmra.mrb[28].mxu1 %vm252_vm5, %v1342_v0 }
0x19a5   :  { %1513 = vmatpush1.bf16.msra.mxu1 %v2726_v55  ;;  %1544 = vmatprep.mubr.bf16.mxu1 %v2276_v1 }
0x19a6   :  { %1514 = vmatprep.subr.bf16.mxu1 %v2732_v61 }
0x19a9   :  { %1515 = vmatpush1.bf16.msra.mxu1 %v2737_v28 }
0x19aa   :  { %1516 = vmatprep.subr.bf16.mxu1 %v2746_v23 }
0x19ad   :  { %1517 = vmatpush1.bf16.msra.mxu1 %v2751_v29 }
0x19ae   :  { %1518 = vmatprep.subr.bf16.mxu1 %v2756_v32 }
0x19b1   :  { %1519 = vmatpush1.bf16.msra.mxu1 %v2763_v3 }
0x19b2   :  { %1674 = vmatprep.subr.bf16.mxu1 %v2721_v33 }
0x1a77   :  { %v1384_v16 = vpop.f32.mrb[28].mxu1 }
0x1a78   :  { %v1391_v37 = vadd.f32 %v1384_v16, %v1345_v12  ;;  %v1386_v41 = vpop.f32.mrb[29].mxu1 }
0x1a79   :  { %v1392_v17 = vadd.f32 %v1386_v41, %v1346_v50  ;;  %v1388_v35 = vpop.f32.mrb[30].mxu1 }
0x1a7a   :  { %v1389_v27 = vpop.f32.mrb[31].mxu1  ;;  %v1981_v33 = vmul.f32 -1.442695, %v1391_v37 }
0x1a7b   :  { %2184 = vtanh.f32 %v1392_v17  ;;  %v1982_v60 = vmul.f32 -1.442695, %v1392_v17 }
0x1a7c   :  { %2186 = vpow2.f32 %v1981_v33 }
0x1a85   :  { %v2185_v38 = vpop.eup %2184 }
0x1a86   :  { %1408 = vrot.lane.b32.xlu1 %v2185_v38, %s2277_s3  ;;  %v2187_v47 = vpop.eup %2186 }
0x1a87   :  { %v1399_v49 = vadd.f32 1.0, %v2187_v47 }
0x1a89   :  { %2188 = vrcp.f32 %v1399_v49 }
0x1a93   :  { %v2189_v46 = vpop.eup %2188 }
0x1a94   :  { %v1406_v52 = vmul.f32 %v2189_v46, %v1335_v13 }
0x1af8   :  { %v1409_v12 = vpop.permute.xlu1 %1408 }
0x1af9   :  { %v1411_v53 = vmul.f32 %v2189_v46, %v1409_v12 }
0x1afb   :  { %1413 = vrot.lane.b32.xlu0 %v1411_v53, %s2277_s3 }
0x1b6d   :  { %v1414_v58 = vpop.permute.xlu0 %1413 }
0x1b6e   :  { %v1416_v21 = vadd.f32 %v1414_v58, %v1406_v52 }
0x1b70   :  { %2190 = vtanh.f32 %v1416_v21 }
0x1b71   :  { %2192 = vpow2.f32 %v1982_v60 }
0x1b7a   :  { %v2191_v50 = vpop.eup %2190 }
0x1b7b   :  { %1419 = vrot.lane.b32.xlu1 %v2191_v50, %s2277_s3  ;;  %v2193_v15 = vpop.eup %2192 }
0x1b7c   :  { %v1400_v56 = vadd.f32 1.0, %v2193_v15 }
0x1b7e   :  { %2194 = vrcp.f32 %v1400_v56 }
0x1b88   :  { %v2195_v7 = vpop.eup %2194 }
0x1bed   :  { %v1420_v34 = vpop.permute.xlu1 %1419 }
0x1bee   :  { %v1422_v44 = vmul.f32 %v2195_v7, %v1420_v34 }
0x1bf0   :  { %v1423_v54 = vpack.c.bf16 %v1422_v44, %v1422_v44  ;;  %1424 = vst.msk [vmem:[#allocation2 + $0x18] sm:$0xff] %vm330_vm3, %v1422_v44 }
0x1bf1   :  { %1425 = vst.msk [vmem:[#allocation2 + $0x20] sm:$0xff] %vm332_vm4, %v1422_v44 }
0x1bf2   :  { %1983 = vmatmul.mubr.msk.bf16.vlgmr.msra.gmra.mrb[48].mxu0 %vm252_vm5, %v1423_v54 }
0x1bf3   :  { %1594 = vmatpush1.bf16.msra.mxu0 %v2726_v55  ;;  %1625 = vmatprep.mubr.bf16.mxu0 %v2276_v1 }
0x1bf4   :  { %1595 = vmatprep.subr.bf16.mxu0 %v2732_v61 }
0x1bf7   :  { %1596 = vmatpush1.bf16.msra.mxu0 %v2737_v28 }
0x1bf8   :  { %1597 = vmatprep.subr.bf16.mxu0 %v2746_v23 }
0x1bfb   :  { %1598 = vmatpush1.bf16.msra.mxu0 %v2751_v29 }
0x1bfc   :  { %1599 = vmatprep.subr.bf16.mxu0 %v2756_v32 }
0x1bff   :  { %1600 = vmatpush1.bf16.msra.mxu0 %v2763_v3 }
0x1cc5   :  { %v1465_v13 = vpop.f32.mrb[48].mxu0 }
0x1cc6   :  { %v1472_v48 = vadd.f32 %v1465_v13, %v1426_v20  ;;  %v1467_v24 = vpop.f32.mrb[49].mxu0 }
0x1cc7   :  { %v1473_v30 = vadd.f32 %v1467_v24, %v1427_v59  ;;  %v1469_v11 = vpop.f32.mrb[50].mxu0 }
0x1cc8   :  { %v1470_v0 = vpop.f32.mrb[51].mxu0  ;;  %v1984_v37 = vmul.f32 -1.442695, %v1472_v48 }
0x1cc9   :  { %2196 = vtanh.f32 %v1473_v30  ;;  %v1985_v59 = vmul.f32 -1.442695, %v1473_v30 }
0x1cca   :  { %2198 = vpow2.f32 %v1984_v37 }
0x1cd3   :  { %v2197_v16 = vpop.eup %2196 }
0x1cd4   :  { %1489 = vrot.lane.b32.xlu0 %v2197_v16, %s2277_s3  ;;  %v2199_v41 = vpop.eup %2198 }
0x1cd5   :  { %v1480_v17 = vadd.f32 1.0, %v2199_v41 }
0x1cd7   :  { %2200 = vrcp.f32 %v1480_v17 }
0x1ce1   :  { %v2201_v22 = vpop.eup %2200 }
0x1ce2   :  { %v1487_v35 = vmul.f32 %v2201_v22, %v1416_v21 }
0x1d46   :  { %v1490_v19 = vpop.permute.xlu0 %1489 }
0x1d47   :  { %v1492_v20 = vmul.f32 %v2201_v22, %v1490_v19 }
0x1d49   :  { %1494 = vrot.lane.b32.xlu1 %v1492_v20, %s2277_s3 }
0x1dbb   :  { %v1495_v27 = vpop.permute.xlu1 %1494 }
0x1dbc   :  { %v1497_v8 = vadd.f32 %v1495_v27, %v1487_v35 }
0x1dbe   :  { %2202 = vtanh.f32 %v1497_v8 }
0x1dbf   :  { %2204 = vpow2.f32 %v1985_v59 }
0x1dc8   :  { %v2203_v26 = vpop.eup %2202 }
0x1dc9   :  { %1500 = vrot.lane.b32.xlu0 %v2203_v26, %s2277_s3  ;;  %v2205_v38 = vpop.eup %2204 }
0x1dca   :  { %v1481_v33 = vadd.f32 1.0, %v2205_v38 }
0x1dcc   :  { %2206 = vrcp.f32 %v1481_v33 }
0x1dd6   :  { %v2207_v47 = vpop.eup %2206 }
0x1e3b   :  { %v1501_v49 = vpop.permute.xlu0 %1500 }
0x1e3c   :  { %v1503_v46 = vmul.f32 %v2207_v47, %v1501_v49 }
0x1e3e   :  { %v1504_v12 = vpack.c.bf16 %v1503_v46, %v1503_v46  ;;  %1505 = vst.msk [vmem:[#allocation2 + $0x20] sm:$0xff] %vm330_vm3, %v1503_v46 }
0x1e3f   :  { %1506 = vst.msk [vmem:[#allocation2 + $0x18] sm:$0xff] %vm332_vm4, %v1503_v46 }
0x1e40   :  { %1986 = vmatmul.mubr.msk.bf16.vlgmr.msra.gmra.mrb[32].mxu1 %vm252_vm5, %v1504_v12 }
0x1e41   :  { %1675 = vmatpush1.bf16.msra.mxu1 %v2726_v55  ;;  %1706 = vmatprep.mubr.bf16.mxu1 %v2276_v1 }
0x1e42   :  { %1676 = vmatprep.subr.bf16.mxu1 %v2732_v61 }
0x1e45   :  { %1677 = vmatpush1.bf16.msra.mxu1 %v2737_v28 }
0x1e46   :  { %1678 = vmatprep.subr.bf16.mxu1 %v2746_v23 }
0x1e49   :  { %1679 = vmatpush1.bf16.msra.mxu1 %v2751_v29 }
0x1e4a   :  { %1680 = vmatprep.subr.bf16.mxu1 %v2756_v32 }
0x1e4d   :  { %1681 = vmatpush1.bf16.msra.mxu1 %v2763_v3 }
0x1f13   :  { %v1546_v53 = vpop.f32.mrb[32].mxu1 }
0x1f14   :  { %v1553_v55 = vadd.f32 %v1546_v53, %v1507_v14  ;;  %v1548_v1 = vpop.f32.mrb[33].mxu1  ;;  %v1752_v53 = vld [vmem:[#allocation2 + $0x18] sm:$0xff] }
0x1f15   :  { %v1554_v61 = vadd.f32 %v1548_v1, %v1508_v51  ;;  %v1550_v28 = vpop.f32.mrb[34].mxu1  ;;  %v1767_v1 = vmul.f32 %v3053_v18, %v1752_v53 }
0x1f16   :  { %v1551_v23 = vpop.f32.mrb[35].mxu1  ;;  %v1987_v32 = vmul.f32 -1.442695, %v1553_v55 }
0x1f17   :  { %2208 = vtanh.f32 %v1554_v61  ;;  %v1988_v51 = vmul.f32 -1.442695, %v1554_v61  ;;  %v1781_v28 = vsel %vm252_vm5, %v1767_v1, 0.0 }
0x1f18   :  { %2210 = vpow2.f32 %v1987_v32 }
0x1f21   :  { %v2209_v29 = vpop.eup %2208 }
0x1f22   :  { %1570 = vrot.lane.b32.xlu1 %v2209_v29, %s2277_s3  ;;  %v2211_v3 = vpop.eup %2210  ;;  %v14_v29 = vstv %s3120_s8 }
0x1f23   :  { %v1561_v52 = vadd.f32 1.0, %v2211_v3  ;;  %15 = vst [vmem:[#allocation3] sm:$0x1] %v14_v29 }
0x1f25   :  { %2212 = vrcp.f32 %v1561_v52 }
0x1f2f   :  { %v2213_v6 = vpop.eup %2212 }
0x1f30   :  { %v1568_v58 = vmul.f32 %v2213_v6, %v1497_v8 }
0x1f94   :  { %v1571_v10 = vpop.permute.xlu1 %1570 }
0x1f95   :  { %v1573_v14 = vmul.f32 %v2213_v6, %v1571_v10 }
0x1f97   :  { %1575 = vrot.lane.b32.xlu0 %v1573_v14, %s2277_s3 }
0x2009   :  { %v1576_v21 = vpop.permute.xlu0 %1575 }
0x200a   :  { %v1578_v9 = vadd.f32 %v1576_v21, %v1568_v58  ;;  %v1753_v21 = vld [vmem:[#allocation2 + $0x20] sm:$0xff] }
0x200c   :  { %2214 = vtanh.f32 %v1578_v9 }
0x200d   :  { %2216 = vpow2.f32 %v1988_v51 }
0x2016   :  { %v2215_v31 = vpop.eup %2214 }
0x2017   :  { %1581 = vrot.lane.b32.xlu1 %v2215_v31, %s2277_s3  ;;  %v2217_v50 = vpop.eup %2216  ;;  %v1768_v31 = vmul.f32 %v3053_v18, %v1753_v21 }
0x2018   :  { %v1562_v60 = vadd.f32 1.0, %v2217_v50 }
0x2019   :  { %v1784_v50 = vsel %vm252_vm5, %v1768_v31, 0.0 }
0x201a   :  { %2218 = vrcp.f32 %v1562_v60 }
0x2024   :  { %v2219_v15 = vpop.eup %2218 }
0x2089   :  { %v1582_v56 = vpop.permute.xlu1 %1581 }
0x208a   :  { %v1584_v7 = vmul.f32 %v2219_v15, %v1582_v56  ;;  %v3070_v15 = vld [vmem:[#allocation3] ss:$0 sm:$0xff] }
0x208c   :  { %v1585_v34 = vpack.c.bf16 %v1584_v7, %v1584_v7  ;;  %1586 = vst.msk [vmem:[#allocation2 + $0x28] sm:$0xff] %vm330_vm3, %v1584_v7 }
0x208d   :  { %1587 = vst.msk [vmem:[#allocation2 + $0x10] sm:$0xff] %vm332_vm4, %v1584_v7 }
0x208e   :  { %1989 = vmatmul.mubr.msk.bf16.vlgmr.msra.gmra.mrb[52].mxu0 %vm252_vm5, %v1585_v34 }
0x2093   :  { %v1754_v61 = vld [vmem:[#allocation2 + $0x28] sm:$0xff] }
0x2094   :  { %v1751_v63 = vld [vmem:[#allocation2 + $0x10] sm:$0xff]  ;;  %v1769_v23 = vmul.f32 %v3053_v18, %v1754_v61 }
0x2096   :  { %v1787_v32 = vsel %vm252_vm5, %v1769_v23, 0.0 }
0x2161   :  { %v1627_v44 = vpop.f32.mrb[52].mxu0 }
0x2162   :  { %v1634_v54 = vadd.f32 %v1627_v44, %v1588_v25  ;;  %v1629_v13 = vpop.f32.mrb[53].mxu0 }
0x2163   :  { %v1635_v48 = vadd.f32 %v1629_v13, %v1589_v4  ;;  %v1631_v24 = vpop.f32.mrb[54].mxu0 }
0x2164   :  { %v1632_v30 = vpop.f32.mrb[55].mxu0  ;;  %v1990_v0 = vmul.f32 -1.442695, %v1634_v54 }
0x2165   :  { %2220 = vtanh.f32 %v1635_v48  ;;  %v1991_v4 = vmul.f32 -1.442695, %v1635_v48 }
0x2166   :  { %2222 = vpow2.f32 %v1990_v0 }
0x216f   :  { %v2221_v11 = vpop.eup %2220 }
0x2170   :  { %1651 = vrot.lane.b32.xlu0 %v2221_v11, %s2277_s3  ;;  %v2223_v16 = vpop.eup %2222 }
0x2171   :  { %v1642_v37 = vadd.f32 1.0, %v2223_v16 }
0x2173   :  { %2224 = vrcp.f32 %v1642_v37 }
0x217d   :  { %v2225_v62 = vpop.eup %2224 }
0x217e   :  { %v1649_v41 = vmul.f32 %v2225_v62, %v1578_v9 }
0x21e2   :  { %v1652_v36 = vpop.permute.xlu0 %1651 }
0x21e3   :  { %v1654_v25 = vmul.f32 %v2225_v62, %v1652_v36 }
0x21e5   :  { %1656 = vrot.lane.b32.xlu1 %v1654_v25, %s2277_s3 }
0x2257   :  { %v1657_v17 = vpop.permute.xlu1 %1656 }
0x2258   :  { %v1659_v5 = vadd.f32 %v1657_v17, %v1649_v41 }
0x225a   :  { %2226 = vtanh.f32 %v1659_v5 }
0x225b   :  { %2228 = vpow2.f32 %v1991_v4 }
0x2264   :  { %v2227_v39 = vpop.eup %2226 }
0x2265   :  { %1662 = vrot.lane.b32.xlu0 %v2227_v39, %s2277_s3  ;;  %v2229_v22 = vpop.eup %2228 }
0x2266   :  { %v1643_v19 = vadd.f32 1.0, %v2229_v22 }
0x2268   :  { %2230 = vrcp.f32 %v1643_v19 }
0x2272   :  { %v2231_v20 = vpop.eup %2230 }
0x22d7   :  { %v1663_v35 = vpop.permute.xlu0 %1662 }
0x22d8   :  { %v1665_v27 = vmul.f32 %v2231_v20, %v1663_v35 }
0x22da   :  { %v1666_v8 = vpack.c.bf16 %v1665_v27, %v1665_v27  ;;  %1667 = vst.msk [vmem:[#allocation2 + $0x30] sm:$0xff] %vm330_vm3, %v1665_v27 }
0x22db   :  { %1668 = vst.msk [vmem:[#allocation2 + $0x8] sm:$0xff] %vm332_vm4, %v1665_v27 }
0x22dc   :  { %1992 = vmatmul.mubr.msk.bf16.vlgmr.msra.gmra.mrb[36].mxu1 %vm252_vm5, %v1666_v8 }
0x22e1   :  { %v1755_v51 = vld [vmem:[#allocation2 + $0x30] sm:$0xff] }
0x22e2   :  { %v1750_v14 = vld [vmem:[#allocation2 + $0x8] sm:$0xff]  ;;  %v1770_v60 = vmul.f32 %v3053_v18, %v1755_v51 }
0x22e3   :  { %v1765_v58 = vmul.f32 %v3053_v18, %v1750_v14 }
0x22e4   :  { %v1790_v56 = vsel %vm252_vm5, %v1770_v60, 0.0 }
0x22e5   :  { %v1775_v9 = vsel %vm252_vm5, %v1765_v58, 0.0 }
0x23af   :  { %v1708_v26 = vpop.f32.mrb[36].mxu1 }
0x23b0   :  { %v1715_v59 = vadd.f32 %v1708_v26, %v1669_v2  ;;  %v1710_v38 = vpop.f32.mrb[37].mxu1 }
0x23b1   :  { %v3045_v33 = vadd.f32 %v1710_v38, %v1670_v57  ;;  %v1712_v47 = vpop.f32.mrb[38].mxu1  ;;  %v1766_v57 = vmul.f32 %v3053_v18, %v1751_v63 }
0x23b2   :  { %v1713_v49 = vpop.f32.mrb[39].mxu1  ;;  %v1993_v40 = vmul.f32 -1.442695, %v1715_v59 }
0x23b3   :  { %2232 = vtanh.f32 %v3045_v33  ;;  %v1778_v55 = vsel %vm252_vm5, %v1766_v57, 0.0  ;;  %v1994_v62 = vmul.f32 -1.442695, %v3045_v33 }
0x23b4   :  { %2234 = vpow2.f32 %v1993_v40 }
0x23bd   :  { %v2233_v46 = vpop.eup %2232 }
0x23be   :  { %1732 = vrot.lane.b32.xlu1 %v2233_v46, %s2277_s3  ;;  %v2235_v12 = vpop.eup %2234 }
0x23bf   :  { %v1723_v42 = vadd.f32 1.0, %v2235_v12 }
0x23c1   :  { %2236 = vrcp.f32 %v1723_v42 }
0x23cb   :  { %v2237_v45 = vpop.eup %2236 }
0x23cc   :  { %v1730_v3 = vmul.f32 %v2237_v45, %v1659_v5 }
0x2430   :  { %v1733_v2 = vpop.permute.xlu1 %1732 }
0x2431   :  { %v1735_v43 = vmul.f32 %v2237_v45, %v1733_v2 }
0x2433   :  { %1737 = vrot.lane.b32.xlu0 %v1735_v43, %s2277_s3 }
0x2452   :  { %1779 = vadd.xlane.f32.xlu0 %v1778_v55 }
0x2456   :  { %1782 = vadd.xlane.f32.xlu0 %v1781_v28 }
0x245a   :  { %1788 = vadd.xlane.f32.xlu0 %v1787_v32 }
0x24a5   :  { %v1738_v52 = vpop.permute.xlu0 %1737 }
0x24a6   :  { %v1740_v6 = vadd.f32 %v1738_v52, %v1730_v3 }
0x24a8   :  { %2238 = vtanh.f32 %v1740_v6 }
0x24b2   :  { %v2239_v10 = vpop.eup %2238 }
0x24b3   :  { %1743 = vrot.lane.b32.xlu1 %v2239_v10, %s2277_s3 }
0x24d7   :  { %1776 = vadd.xlane.f32.xlu1 %v1775_v9 }
0x24db   :  { %1785 = vadd.xlane.f32.xlu1 %v1784_v50 }
0x24df   :  { %1791 = vadd.xlane.f32.xlu1 %v1790_v56  ;;  %v1780_v7 = vpop.xlane.xlu0 %1779 }
0x24e0   :  { %v1805_v34 = vadd.f32 %v3070_v15, %v1780_v7 }
0x24e2   :  { %v1999_v44 = vmul.f32 -1.442695, %v1805_v34 }
0x24e3   :  { %v1783_v54 = vpop.xlane.xlu0 %1782 }
0x24e4   :  { %2240 = vpow2.f32 %v1999_v44  ;;  %v1806_v13 = vadd.f32 %v3070_v15, %v1783_v54 }
0x24e6   :  { %v2000_v48 = vmul.f32 -1.442695, %v1806_v13 }
0x24e7   :  { %v1789_v27 = vpop.xlane.xlu0 %1788 }
0x24e8   :  { %2242 = vpow2.f32 %v2000_v48  ;;  %v1808_v8 = vadd.f32 %v3070_v15, %v1789_v27 }
0x24ea   :  { %v2002_v33 = vmul.f32 -1.442695, %v1808_v8 }
0x24ee   :  { %v2241_v24 = vpop.eup %2240 }
0x24ef   :  { %v1837_v30 = vadd.f32 1.0, %v2241_v24 }
0x24f1   :  { %2244 = vrcp.f32 %v1837_v30 }
0x24f2   :  { %v2243_v11 = vpop.eup %2242 }
0x24f3   :  { %v1838_v0 = vadd.f32 1.0, %v2243_v11 }
0x24f5   :  { %2246 = vrcp.f32 %v1838_v0 }
0x24f6   :  { %2248 = vpow2.f32 %v1994_v62 }
0x24fb   :  { %v2245_v16 = vpop.eup %2244 }
0x24fc   :  { %1871 = vperm.xlu1 %2008, %v2245_v16  }
0x24ff   :  { %v2247_v37 = vpop.eup %2246 }
0x2500   :  { %1876 = vperm.xlu1 %2008, %v2247_v37   ;;  %v2249_v36 = vpop.eup %2248 }
0x2501   :  { %v1724_v25 = vadd.f32 1.0, %v2249_v36 }
0x2503   :  { %2250 = vrcp.f32 %v1724_v25 }
0x250d   :  { %v2251_v41 = vpop.eup %2250 }
0x2525   :  { %v1744_v17 = vpop.permute.xlu1 %1743 }
0x2526   :  { %v1746_v5 = vmul.f32 %v2251_v41, %v1744_v17 }
0x2528   :  { %1747 = vst.msk [vmem:[#allocation2 + $0x38] sm:$0xff] %vm330_vm3, %v1746_v5 }
0x2529   :  { %1748 = vst.msk [vmem:[#allocation2] sm:$0xff] %vm332_vm4, %v1746_v5 }
0x252f   :  { %v1756_v4 = vld [vmem:[#allocation2 + $0x38] sm:$0xff] }
0x2530   :  { %v1749_v39 = vld [vmem:[#allocation2] sm:$0xff]  ;;  %v1771_v20 = vmul.f32 %v3053_v18, %v1756_v4 }
0x2531   :  { %v1764_v22 = vmul.f32 %v3053_v18, %v1749_v39 }
0x2532   :  { %v1793_v35 = vsel %vm252_vm5, %v1771_v20, 0.0 }
0x2533   :  { %v1772_v19 = vsel %vm252_vm5, %v1764_v22, 0.0 }
0x2534   :  { %1773 = vadd.xlane.f32.xlu0 %v1772_v19 }
0x2538   :  { %1794 = vadd.xlane.f32.xlu0 %v1793_v35 }
0x2564   :  { %v1777_v26 = vpop.xlane.xlu1 %1776 }
0x2565   :  { %v1804_v59 = vadd.f32 %v3070_v15, %v1777_v26 }
0x2567   :  { %v1998_v38 = vmul.f32 -1.442695, %v1804_v59 }
0x2568   :  { %v1786_v47 = vpop.xlane.xlu1 %1785 }
0x2569   :  { %2252 = vpow2.f32 %v1998_v38  ;;  %v1807_v49 = vadd.f32 %v3070_v15, %v1786_v47 }
0x256a   :  { %2254 = vpow2.f32 %v2002_v33 }
0x256b   :  { %v2001_v46 = vmul.f32 -1.442695, %v1807_v49 }
0x256c   :  { %v1792_v40 = vpop.xlane.xlu1 %1791 }
0x256d   :  { %2256 = vpow2.f32 %v2001_v46  ;;  %v1809_v12 = vadd.f32 %v3070_v15, %v1792_v40 }
0x256f   :  { %v2003_v42 = vmul.f32 -1.442695, %v1809_v12 }
0x2571   :  { %2258 = vpow2.f32 %v2003_v42 }
0x2573   :  { %v2253_v45 = vpop.eup %2252 }
0x2574   :  { %v1836_v2 = vadd.f32 1.0, %v2253_v45  ;;  %v2255_v43 = vpop.eup %2254 }
0x2575   :  { %v1840_v57 = vadd.f32 1.0, %v2255_v43 }
0x2576   :  { %2260 = vrcp.f32 %v1836_v2 }
0x2577   :  { %v2257_v63 = vpop.eup %2256 }
0x2578   :  { %v1839_v18 = vadd.f32 1.0, %v2257_v63 }
0x257a   :  { %2262 = vrcp.f32 %v1839_v18 }
0x257b   :  { %v2259_v53 = vpop.eup %2258  ;;  %v1872_v55 = vpop.permute.xlu1 %1871  ;;  %2264 = vrcp.f32 %v1840_v57 }
0x257c   :  { %1901 = vst [vmem:[%s3121_s9 + $0x10] sm:$0xff] %v1872_v55  ;;  %v1841_v1 = vadd.f32 1.0, %v2259_v53 }
0x257e   :  { %2266 = vrcp.f32 %v1841_v1 }
0x257f   :  { %v1877_v61 = vpop.permute.xlu1 %1876 }
0x2580   :  { %v2261_v28 = vpop.eup %2260  ;;  %1902 = vst [vmem:[%s3121_s9 + $0x18] sm:$0xff] %v1877_v61 }
0x2581   :  { %1866 = vperm.xlu0 %2007, %v2261_v28  }
0x2584   :  { %v2263_v23 = vpop.eup %2262 }
0x2585   :  { %1881 = vperm.xlu1 %2008, %v2263_v23   ;;  %v2265_v29 = vpop.eup %2264 }
0x2588   :  { %v2267_v32 = vpop.eup %2266 }
0x2589   :  { %1886 = vperm.xlu1 %2008, %v2265_v29  }
0x258d   :  { %1891 = vperm.xlu1 %2008, %v2267_v32  }
0x25c1   :  { %v1774_v3 = vpop.xlane.xlu0 %1773 }
0x25c2   :  { %v1803_v52 = vadd.f32 %v3070_v15, %v1774_v3 }
0x25c4   :  { %v1997_v6 = vmul.f32 -1.442695, %v1803_v52 }
0x25c5   :  { %v1795_v10 = vpop.xlane.xlu0 %1794 }
0x25c6   :  { %2268 = vpow2.f32 %v1997_v6  ;;  %v1810_v14 = vadd.f32 %v3070_v15, %v1795_v10 }
0x25c8   :  { %v2004_v58 = vmul.f32 -1.442695, %v1810_v14 }
0x25ca   :  { %2270 = vpow2.f32 %v2004_v58 }
0x25d0   :  { %v2269_v21 = vpop.eup %2268 }
0x25d1   :  { %v1835_v9 = vadd.f32 1.0, %v2269_v21 }
0x25d3   :  { %2272 = vrcp.f32 %v1835_v9 }
0x25d4   :  { %v2271_v31 = vpop.eup %2270 }
0x25d5   :  { %v1842_v51 = vadd.f32 1.0, %v2271_v31 }
0x25d7   :  { %2274 = vrcp.f32 %v1842_v51 }
0x25dd   :  { %v2273_v50 = vpop.eup %2272 }
0x25de   :  { %1861 = vperm.xlu1 %2008, %v2273_v50  }
0x25e1   :  { %v2275_v60 = vpop.eup %2274 }
0x25e2   :  { %1896 = vperm.xlu1 %2008, %v2275_v60  }
0x2600   :  { %v1867_v56 = vpop.permute.xlu0 %1866 }
0x2601   :  { %1900 = vst [vmem:[%s3121_s9 + $0x8] sm:$0xff] %v1867_v56 }
0x2604   :  { %v1882_v7 = vpop.permute.xlu1 %1881 }
0x2605   :  { %1903 = vst [vmem:[%s3121_s9 + $0x20] sm:$0xff] %v1882_v7 }
0x2608   :  { %v1887_v15 = vpop.permute.xlu1 %1886 }
0x2609   :  { %1904 = vst [vmem:[%s3121_s9 + $0x28] sm:$0xff] %v1887_v15 }
0x260c   :  { %v1892_v34 = vpop.permute.xlu1 %1891 }
0x260d   :  { %1905 = vst [vmem:[%s3121_s9 + $0x30] sm:$0xff] %v1892_v34 }
0x265d   :  { %v1862_v44 = vpop.permute.xlu1 %1861 }
0x265e   :  { %1899 = vst [vmem:[%s3121_s9] sm:$0xff] %v1862_v44 }
0x2661   :  { %v1897_v54 = vpop.permute.xlu1 %1896 }
0x2662   :  { %1906 = vst [vmem:[%s3121_s9 + $0x38] sm:$0xff] %v1897_v54 }

</bundles_post_ra>
